<compile_context>
chip_gen: v7x
topology: tpu7x:2x2x1
jax: 0.10.0
libtpu: 0.0.40
codegen_flags: <defaults>
</compile_context>

<pallas_src>
import functools
import math

import jax
import jax.numpy as jnp
from jax import lax
from jax.experimental import pallas as pl
from jax.experimental.pallas import tpu as pltpu

CFG = dict(
    vocab=100,      # vocab_size
    hidden=32,      # hidden_size
    heads=2,        # num_attention_heads
    layers=2,       # num_hidden_layers
    inter=64,       # intermediate_size
    max_pos=64,     # max_position_embeddings
    type_vocab=2,   # type_vocab_size
    num_labels=4,   # num_labels
)

LN_EPS = 1e-12          # BERT LayerNorm eps
MASK_NEG = -1e9         # bounded additive mask bias (safer than finfo.min)
ROW_ALIGN = 8           # sublane alignment for packed slab sections
OUT_ROWS, OUT_COLS = 8, 128   # lane-dense fused output block (logits + loss)

_VMEM = pl.BlockSpec(memory_space=pltpu.MemorySpace.VMEM)
_SMEM = pl.BlockSpec(memory_space=pltpu.MemorySpace.SMEM)


def _round_up(n, m=ROW_ALIGN):
    return -(-n // m) * m


# ----------------------------------------------------------------------------
# Slab layout: all weights packed into 3 row-stacked slabs (one per column
# width) so the kernel sees 3 weight DMAs instead of 24 tiny ones.  Offsets
# are pure functions of CFG (static Python ints at trace time).
# ----------------------------------------------------------------------------
def _slab_layout():
    H, I, L = CFG["hidden"], CFG["inter"], CFG["layers"]

    def build(entries):
        offs, row = {}, 0
        for name, r in entries:
            offs[name] = row
            row += _round_up(r)
        return offs, row

    h_entries = [("word", CFG["vocab"]), ("pos", CFG["max_pos"]),
                 ("type", CFG["type_vocab"]), ("emb_ln_g", 1), ("emb_ln_b", 1)]
    for l in range(L):
        h_entries += [(f"wo{l}", H), (f"bo{l}", 1), (f"ln1g{l}", 1),
                      (f"ln1b{l}", 1), (f"w2{l}", I), (f"b2{l}", 1),
                      (f"ln2g{l}", 1), (f"ln2b{l}", 1)]
    h_entries += [("pool_w", H), ("pool_b", 1), ("cls_w", H), ("cls_b", 1)]

    q_entries, i_entries = [], []
    for l in range(L):
        q_entries += [(f"wqkv{l}", H), (f"bqkv{l}", 1)]
        i_entries += [(f"w1_{l}", H), (f"b1_{l}", 1)]
    return build(h_entries), build(q_entries), build(i_entries)


# ----------------------------------------------------------------------------
# In-kernel helpers (values already in VMEM / vregs)
# ----------------------------------------------------------------------------
def _ln(x, g, b):
    mean = jnp.mean(x, axis=-1, keepdims=True)
    var = jnp.mean((x - mean) * (x - mean), axis=-1, keepdims=True)
    return (x - mean) * lax.rsqrt(var + LN_EPS) * g + b


def _mm(a, b):
    # bf16 MXU operands, f32 accumulation.
    return jnp.dot(a.astype(jnp.bfloat16), b.astype(jnp.bfloat16),
                   preferred_element_type=jnp.float32)


def _gelu(x):
    # TODO(synk): HF BERT "gelu" is the exact erf-based form; tanh approximation
    # used here (Mosaic erf lowering support is uncertain).
    return 0.5 * x * (1.0 + jnp.tanh(0.7978845608028654 * (x + 0.044715 * x * x * x)))


# ----------------------------------------------------------------------------
# The single fused kernel
# ----------------------------------------------------------------------------
def _bert_kernel(ids_ref, aux_ref,
                 slab_h_ref, slab_q_ref, slab_i_ref,
                 out_ref, scratch_ref,
                 *, B, S, H, nH, dH, L, I, NL, h_offs, q_offs, i_offs):
    def hsec(off, rows):                       # static slice of the H-column slab
        return slab_h_ref[off:off + rows, :]

    # ---- embeddings: exact gather via SMEM ids + dynamic VMEM row reads ----
    for i in range(B * S):                     # B*S = 16, fully unrolled
        tok = ids_ref[i]                       # SMEM scalar
        scratch_ref[i:i + 1, :] = slab_h_ref[pl.ds(h_offs["word"] + tok, 1), :]
    emb = scratch_ref[...]                     # (B*S, H) f32 gathered word embs
    emb = (emb.reshape(B, S, H)
           + hsec(h_offs["pos"], S)[None, :, :]        # position ids 0..S-1
           + hsec(h_offs["type"], 1)[None, :, :])      # token_type_ids == 0
    x = _ln(emb.reshape(B * S, H),
            hsec(h_offs["emb_ln_g"], 1), hsec(h_offs["emb_ln_b"], 1))
    # (dropout skipped: eval-mode semantics)

    # additive mask bias over the key axis
    mask = aux_ref[:, 0:S]                                      # (B, S)
    mask_bias = ((1.0 - mask) * MASK_NEG)[:, None, :]           # (B, 1, S)

    # ---- encoder layers (L small & static -> unrolled) ----
    for l in range(L):
        wqkv = slab_q_ref[q_offs[f"wqkv{l}"]:q_offs[f"wqkv{l}"] + H, :]
        bqkv = slab_q_ref[q_offs[f"bqkv{l}"]:q_offs[f"bqkv{l}"] + 1, :]
        qkv = _mm(x, wqkv) + bqkv              # (B*S, 3H); 1/sqrt(dH) pre-folded into Q cols
        qkv3 = qkv.reshape(B, S, 3 * H)
        for h in range(nH):                    # static head loop (nH = 2)
            qh = qkv3[:, :, h * dH:(h + 1) * dH]
            kh = qkv3[:, :, H + h * dH:H + (h + 1) * dH]
            vh = qkv3[:, :, 2 * H + h * dH:2 * H + (h + 1) * dH]
            s = jnp.einsum("bqd,bkd->bqk",
                           qh.astype(jnp.bfloat16), kh.astype(jnp.bfloat16),
                           preferred_element_type=jnp.float32) + mask_bias
            m = jnp.max(s, axis=-1, keepdims=True)
            e = jnp.exp(s - m)
            p_attn = e * pl.reciprocal(jnp.sum(e, axis=-1, keepdims=True), approx=True)
            ctx = jnp.einsum("bqk,bkd->bqd",
                             p_attn.astype(jnp.bfloat16), vh.astype(jnp.bfloat16),
                             preferred_element_type=jnp.float32)   # (B, S, dH)
            # head merge via static-lane-offset scratch stores (no lane concat)
            scratch_ref[:, h * dH:(h + 1) * dH] = ctx.reshape(B * S, dH)

        attn_out = _mm(scratch_ref[...], hsec(h_offs[f"wo{l}"], H)) + hsec(h_offs[f"bo{l}"], 1)
        x = _ln(attn_out + x, hsec(h_offs[f"ln1g{l}"], 1), hsec(h_offs[f"ln1b{l}"], 1))

        w1 = slab_i_ref[i_offs[f"w1_{l}"]:i_offs[f"w1_{l}"] + H, :]
        b1 = slab_i_ref[i_offs[f"b1_{l}"]:i_offs[f"b1_{l}"] + 1, :]
        inter = _gelu(_mm(x, w1) + b1)
        ffn_out = _mm(inter, hsec(h_offs[f"w2{l}"], I)) + hsec(h_offs[f"b2{l}"], 1)
        x = _ln(ffn_out + x, hsec(h_offs[f"ln2g{l}"], 1), hsec(h_offs[f"ln2b{l}"], 1))

    # ---- pooler (tanh on [CLS]) + classifier ----
    cls = x.reshape(B, S, H)[:, 0:1, :].reshape(B, H)
    pooled = jnp.tanh(_mm(cls, hsec(h_offs["pool_w"], H)) + hsec(h_offs["pool_b"], 1))
    logits_full = _mm(pooled, hsec(h_offs["cls_w"], H)) + hsec(h_offs["cls_b"], 1)  # (B, H), cols>=NL are zero
    logits = logits_full[:, :NL]                                  # (B, NL)

    # ---- BCEWithLogitsLoss (multi_label_classification), mean reduction ----
    y = aux_ref[:, S:S + NL]                                      # (B, NL)
    bce = (jnp.maximum(logits, 0.0) - logits * y
           + jnp.log(1.0 + jnp.exp(-jnp.abs(logits))))
    ssum = jnp.sum(bce, axis=-1, keepdims=True)                   # (B, 1)
    ssum = jnp.sum(ssum, axis=0, keepdims=True)                   # (1, 1)
    loss = ssum / float(B * NL)

    # ---- single lane-dense output block: logits at [:B,:NL], loss at [0,NL] ----
    out_ref[...] = jnp.zeros((OUT_ROWS, OUT_COLS), jnp.float32)
    out_ref[0:B, 0:NL] = logits
    out_ref[0:1, NL:NL + 1] = loss


# ----------------------------------------------------------------------------
# Parameters: deterministic synthetic init (raw), then packed into 3 slabs
# ----------------------------------------------------------------------------
def init_params(key):
    H, I, L, NL = CFG["hidden"], CFG["inter"], CFG["layers"], CFG["num_labels"]
    ks = iter(jax.random.split(key, 64))

    def nrm(shape):
        return 0.02 * jax.random.normal(next(ks), shape, jnp.float32)

    def stack(shape):
        return jnp.stack([nrm(shape) for _ in range(L)], axis=0)

    return dict(
        word_emb=nrm((CFG["vocab"], H)),
        pos_emb=nrm((CFG["max_pos"], H)),
        type_emb=nrm((CFG["type_vocab"], H)),
        emb_ln_g=jnp.ones((1, H), jnp.float32),
        emb_ln_b=jnp.zeros((1, H), jnp.float32),
        wqkv=stack((H, 3 * H)),                      # fused Q|K|V weight
        bqkv=jnp.zeros((L, 1, 3 * H), jnp.float32),
        wo=stack((H, H)),
        bo=jnp.zeros((L, 1, H), jnp.float32),
        ln1_g=jnp.ones((L, 1, H), jnp.float32),
        ln1_b=jnp.zeros((L, 1, H), jnp.float32),
        w1=stack((H, I)),
        b1=jnp.zeros((L, 1, I), jnp.float32),
        w2=stack((I, H)),
        b2=jnp.zeros((L, 1, H), jnp.float32),
        ln2_g=jnp.ones((L, 1, H), jnp.float32),
        ln2_b=jnp.zeros((L, 1, H), jnp.float32),
        pool_w=nrm((H, H)),
        pool_b=jnp.zeros((1, H), jnp.float32),
        cls_w=nrm((H, NL)),
        cls_b=jnp.zeros((1, NL), jnp.float32),
    )


def pack_params(p):
    H, I, L = CFG["hidden"], CFG["inter"], CFG["layers"]
    dH = H // CFG["heads"]
    (h_offs, h_rows), (q_offs, q_rows), (i_offs, i_rows) = _slab_layout()

    def put(slab, off, a):
        return slab.at[off:off + a.shape[0], :a.shape[1]].set(a)

    slab_h = jnp.zeros((h_rows, H), jnp.float32)
    slab_h = put(slab_h, h_offs["word"], p["word_emb"])
    slab_h = put(slab_h, h_offs["pos"], p["pos_emb"])
    slab_h = put(slab_h, h_offs["type"], p["type_emb"])
    slab_h = put(slab_h, h_offs["emb_ln_g"], p["emb_ln_g"])
    slab_h = put(slab_h, h_offs["emb_ln_b"], p["emb_ln_b"])
    for l in range(L):
        slab_h = put(slab_h, h_offs[f"wo{l}"], p["wo"][l])
        slab_h = put(slab_h, h_offs[f"bo{l}"], p["bo"][l])
        slab_h = put(slab_h, h_offs[f"ln1g{l}"], p["ln1_g"][l])
        slab_h = put(slab_h, h_offs[f"ln1b{l}"], p["ln1_b"][l])
        slab_h = put(slab_h, h_offs[f"w2{l}"], p["w2"][l])
        slab_h = put(slab_h, h_offs[f"b2{l}"], p["b2"][l])
        slab_h = put(slab_h, h_offs[f"ln2g{l}"], p["ln2_g"][l])
        slab_h = put(slab_h, h_offs[f"ln2b{l}"], p["ln2_b"][l])
    slab_h = put(slab_h, h_offs["pool_w"], p["pool_w"])
    slab_h = put(slab_h, h_offs["pool_b"], p["pool_b"])
    slab_h = put(slab_h, h_offs["cls_w"], p["cls_w"])    # (H, NL) zero-padded to H cols
    slab_h = put(slab_h, h_offs["cls_b"], p["cls_b"])

    # fold 1/sqrt(dH) attention scale into the Q columns of the fused QKV proj
    scale = 1.0 / math.sqrt(dH)
    slab_q = jnp.zeros((q_rows, 3 * H), jnp.float32)
    slab_i = jnp.zeros((i_rows, I), jnp.float32)
    for l in range(L):
        slab_q = put(slab_q, q_offs[f"wqkv{l}"], p["wqkv"][l].at[:, :H].multiply(scale))
        slab_q = put(slab_q, q_offs[f"bqkv{l}"], p["bqkv"][l].at[:, :H].multiply(scale))
        slab_i = put(slab_i, i_offs[f"w1_{l}"], p["w1"][l])
        slab_i = put(slab_i, i_offs[f"b1_{l}"], p["b1"][l])

    return dict(slab_h=slab_h, slab_q=slab_q, slab_i=slab_i)


# ----------------------------------------------------------------------------
# Forward pass wrapper: one pallas_call for the whole model (5 inputs total)
# ----------------------------------------------------------------------------
def jiagu_text_bert_forward(packed, input_ids, attention_mask=None, labels=None):
    B, S = input_ids.shape
    H, nH, L = CFG["hidden"], CFG["heads"], CFG["layers"]
    I, NL = CFG["inter"], CFG["num_labels"]
    dH = H // nH
    (h_offs, _), (q_offs, _), (i_offs, _) = _slab_layout()

    if attention_mask is None:
        attention_mask = jnp.ones((B, S), jnp.int32)
    have_labels = labels is not None
    labels_arr = (labels.astype(jnp.float32) if have_labels
                  else jnp.zeros((B, NL), jnp.float32))
    # fuse mask + labels into one small VMEM input (one DMA)
    aux = jnp.concatenate([attention_mask.astype(jnp.float32), labels_arr], axis=1)

    kernel = functools.partial(
        _bert_kernel, B=B, S=S, H=H, nH=nH, dH=dH, L=L, I=I, NL=NL,
        h_offs=h_offs, q_offs=q_offs, i_offs=i_offs)

    out = pl.pallas_call(
        kernel,
        out_shape=jax.ShapeDtypeStruct((OUT_ROWS, OUT_COLS), jnp.float32),
        in_specs=[_SMEM, _VMEM, _VMEM, _VMEM, _VMEM],
        out_specs=_VMEM,
        scratch_shapes=[pltpu.VMEM((B * S, H), jnp.float32)],   # emb gather / head-merge slab
    )(
        input_ids.reshape(B * S).astype(jnp.int32),   # token ids -> SMEM scalars
        aux,                                          # [mask | labels]
        packed["slab_h"], packed["slab_q"], packed["slab_i"],
    )

    logits = out[:B, :NL]
    loss = out[0, NL]
    return (loss if have_labels else None), logits


# ----------------------------------------------------------------------------
if __name__ == "__main__":
    key = jax.random.PRNGKey(0)
    pkey, idkey = jax.random.split(key)

    params = init_params(pkey)
    packed = pack_params(params)

    B, S = 2, 8
    input_ids = jax.random.randint(idkey, (B, S), 0, CFG["vocab"], dtype=jnp.int32)
    attention_mask = jnp.ones((B, S), jnp.int32).at[1, 6:].set(0)   # pad last 2 of seq 1
    labels = jnp.array([[1, 0, 1, 0],
                        [0, 1, 0, 0]], dtype=jnp.float32)

    fwd = jax.jit(jiagu_text_bert_forward)
    loss, logits = fwd(packed, input_ids, attention_mask, labels)
    jax.block_until_ready((loss, logits))

    assert logits.shape == (B, CFG["num_labels"])
    assert loss.shape == ()
    assert bool(jnp.isfinite(loss)) and bool(jnp.all(jnp.isfinite(logits)))
    print("KERNEL_OK")
</pallas_src>

<mosaic_0001>
module attributes {stable_mosaic.version = 11 : i64} {
  func.func @_bert_kernel(%arg0: memref<16xi32, #tpu.memory_space<smem>>, %arg1: memref<2x12xf32, #tpu.memory_space<vmem>>, %arg2: memref<560x32xf32, #tpu.memory_space<vmem>>, %arg3: memref<80x96xf32, #tpu.memory_space<vmem>>, %arg4: memref<80x64xf32, #tpu.memory_space<vmem>>, %arg5: memref<8x128xf32, #tpu.memory_space<vmem>>, %arg6: memref<16x32xf32, #tpu.memory_space<vmem>>) attributes {dimension_semantics = [], scalar_prefetch = 0 : i64, scratch_operands = 1 : i64, tpu.core_type = #tpu.core_type<tc>} {
    %c0 = arith.constant 0 : index
    %0 = memref.load %arg0[%c0] : memref<16xi32, #tpu.memory_space<smem>>
    %c0_i32 = arith.constant 0 : i32
    %1 = arith.addi %c0_i32, %0 : i32
    %2 = arith.index_cast %1 : i32 to index
    %c0_0 = arith.constant 0 : index
    %3 = vector.load %arg2[%2, %c0_0] : memref<560x32xf32, #tpu.memory_space<vmem>>, vector<1x32xf32>
    %c0_1 = arith.constant 0 : index
    %c0_2 = arith.constant 0 : index
    %4 = vector.load %arg6[%c0_1, %c0_2] : memref<16x32xf32, #tpu.memory_space<vmem>>, vector<1x32xf32>
    tpu.vector_store %arg6[%c0_1, %c0_2], %3 {strides = array<i32>} : memref<16x32xf32, #tpu.memory_space<vmem>>, vector<1x32xf32>,
    %c1 = arith.constant 1 : index
    %5 = memref.load %arg0[%c1] : memref<16xi32, #tpu.memory_space<smem>>
    %c0_i32_3 = arith.constant 0 : i32
    %6 = arith.addi %c0_i32_3, %5 : i32
    %7 = arith.index_cast %6 : i32 to index
    %c0_4 = arith.constant 0 : index
    %8 = vector.load %arg2[%7, %c0_4] : memref<560x32xf32, #tpu.memory_space<vmem>>, vector<1x32xf32>
    %c1_5 = arith.constant 1 : index
    %c0_6 = arith.constant 0 : index
    %9 = vector.load %arg6[%c1_5, %c0_6] : memref<16x32xf32, #tpu.memory_space<vmem>>, vector<1x32xf32>
    tpu.vector_store %arg6[%c1_5, %c0_6], %8 {strides = array<i32>} : memref<16x32xf32, #tpu.memory_space<vmem>>, vector<1x32xf32>,
    %c2 = arith.constant 2 : index
    %10 = memref.load %arg0[%c2] : memref<16xi32, #tpu.memory_space<smem>>
    %c0_i32_7 = arith.constant 0 : i32
    %11 = arith.addi %c0_i32_7, %10 : i32
    %12 = arith.index_cast %11 : i32 to index
    %c0_8 = arith.constant 0 : index
    %13 = vector.load %arg2[%12, %c0_8] : memref<560x32xf32, #tpu.memory_space<vmem>>, vector<1x32xf32>
    %c2_9 = arith.constant 2 : index
    %c0_10 = arith.constant 0 : index
    %14 = vector.load %arg6[%c2_9, %c0_10] : memref<16x32xf32, #tpu.memory_space<vmem>>, vector<1x32xf32>
    tpu.vector_store %arg6[%c2_9, %c0_10], %13 {strides = array<i32>} : memref<16x32xf32, #tpu.memory_space<vmem>>, vector<1x32xf32>,
    %c3 = arith.constant 3 : index
    %15 = memref.load %arg0[%c3] : memref<16xi32, #tpu.memory_space<smem>>
    %c0_i32_11 = arith.constant 0 : i32
    %16 = arith.addi %c0_i32_11, %15 : i32
    %17 = arith.index_cast %16 : i32 to index
    %c0_12 = arith.constant 0 : index
    %18 = vector.load %arg2[%17, %c0_12] : memref<560x32xf32, #tpu.memory_space<vmem>>, vector<1x32xf32>
    %c3_13 = arith.constant 3 : index
    %c0_14 = arith.constant 0 : index
    %19 = vector.load %arg6[%c3_13, %c0_14] : memref<16x32xf32, #tpu.memory_space<vmem>>, vector<1x32xf32>
    tpu.vector_store %arg6[%c3_13, %c0_14], %18 {strides = array<i32>} : memref<16x32xf32, #tpu.memory_space<vmem>>, vector<1x32xf32>,
    %c4 = arith.constant 4 : index
    %20 = memref.load %arg0[%c4] : memref<16xi32, #tpu.memory_space<smem>>
    %c0_i32_15 = arith.constant 0 : i32
    %21 = arith.addi %c0_i32_15, %20 : i32
    %22 = arith.index_cast %21 : i32 to index
    %c0_16 = arith.constant 0 : index
    %23 = vector.load %arg2[%22, %c0_16] : memref<560x32xf32, #tpu.memory_space<vmem>>, vector<1x32xf32>
    %c4_17 = arith.constant 4 : index
    %c0_18 = arith.constant 0 : index
    %24 = vector.load %arg6[%c4_17, %c0_18] : memref<16x32xf32, #tpu.memory_space<vmem>>, vector<1x32xf32>
    tpu.vector_store %arg6[%c4_17, %c0_18], %23 {strides = array<i32>} : memref<16x32xf32, #tpu.memory_space<vmem>>, vector<1x32xf32>,
    %c5 = arith.constant 5 : index
    %25 = memref.load %arg0[%c5] : memref<16xi32, #tpu.memory_space<smem>>
    %c0_i32_19 = arith.constant 0 : i32
    %26 = arith.addi %c0_i32_19, %25 : i32
    %27 = arith.index_cast %26 : i32 to index
    %c0_20 = arith.constant 0 : index
    %28 = vector.load %arg2[%27, %c0_20] : memref<560x32xf32, #tpu.memory_space<vmem>>, vector<1x32xf32>
    %c5_21 = arith.constant 5 : index
    %c0_22 = arith.constant 0 : index
    %29 = vector.load %arg6[%c5_21, %c0_22] : memref<16x32xf32, #tpu.memory_space<vmem>>, vector<1x32xf32>
    tpu.vector_store %arg6[%c5_21, %c0_22], %28 {strides = array<i32>} : memref<16x32xf32, #tpu.memory_space<vmem>>, vector<1x32xf32>,
    %c6 = arith.constant 6 : index
    %30 = memref.load %arg0[%c6] : memref<16xi32, #tpu.memory_space<smem>>
    %c0_i32_23 = arith.constant 0 : i32
    %31 = arith.addi %c0_i32_23, %30 : i32
    %32 = arith.index_cast %31 : i32 to index
    %c0_24 = arith.constant 0 : index
    %33 = vector.load %arg2[%32, %c0_24] : memref<560x32xf32, #tpu.memory_space<vmem>>, vector<1x32xf32>
    %c6_25 = arith.constant 6 : index
    %c0_26 = arith.constant 0 : index
    %34 = vector.load %arg6[%c6_25, %c0_26] : memref<16x32xf32, #tpu.memory_space<vmem>>, vector<1x32xf32>
    tpu.vector_store %arg6[%c6_25, %c0_26], %33 {strides = array<i32>} : memref<16x32xf32, #tpu.memory_space<vmem>>, vector<1x32xf32>,
    %c7 = arith.constant 7 : index
    %35 = memref.load %arg0[%c7] : memref<16xi32, #tpu.memory_space<smem>>
    %c0_i32_27 = arith.constant 0 : i32
    %36 = arith.addi %c0_i32_27, %35 : i32
    %37 = arith.index_cast %36 : i32 to index
    %c0_28 = arith.constant 0 : index
    %38 = vector.load %arg2[%37, %c0_28] : memref<560x32xf32, #tpu.memory_space<vmem>>, vector<1x32xf32>
    %c7_29 = arith.constant 7 : index
    %c0_30 = arith.constant 0 : index
    %39 = vector.load %arg6[%c7_29, %c0_30] : memref<16x32xf32, #tpu.memory_space<vmem>>, vector<1x32xf32>
    tpu.vector_store %arg6[%c7_29, %c0_30], %38 {strides = array<i32>} : memref<16x32xf32, #tpu.memory_space<vmem>>, vector<1x32xf32>,
    %c8 = arith.constant 8 : index
    %40 = memref.load %arg0[%c8] : memref<16xi32, #tpu.memory_space<smem>>
    %c0_i32_31 = arith.constant 0 : i32
    %41 = arith.addi %c0_i32_31, %40 : i32
    %42 = arith.index_cast %41 : i32 to index
    %c0_32 = arith.constant 0 : index
    %43 = vector.load %arg2[%42, %c0_32] : memref<560x32xf32, #tpu.memory_space<vmem>>, vector<1x32xf32>
    %c8_33 = arith.constant 8 : index
    %c0_34 = arith.constant 0 : index
    %44 = vector.load %arg6[%c8_33, %c0_34] : memref<16x32xf32, #tpu.memory_space<vmem>>, vector<1x32xf32>
    tpu.vector_store %arg6[%c8_33, %c0_34], %43 {strides = array<i32>} : memref<16x32xf32, #tpu.memory_space<vmem>>, vector<1x32xf32>,
    %c9 = arith.constant 9 : index
    %45 = memref.load %arg0[%c9] : memref<16xi32, #tpu.memory_space<smem>>
    %c0_i32_35 = arith.constant 0 : i32
    %46 = arith.addi %c0_i32_35, %45 : i32
    %47 = arith.index_cast %46 : i32 to index
    %c0_36 = arith.constant 0 : index
    %48 = vector.load %arg2[%47, %c0_36] : memref<560x32xf32, #tpu.memory_space<vmem>>, vector<1x32xf32>
    %c9_37 = arith.constant 9 : index
    %c0_38 = arith.constant 0 : index
    %49 = vector.load %arg6[%c9_37, %c0_38] : memref<16x32xf32, #tpu.memory_space<vmem>>, vector<1x32xf32>
    tpu.vector_store %arg6[%c9_37, %c0_38], %48 {strides = array<i32>} : memref<16x32xf32, #tpu.memory_space<vmem>>, vector<1x32xf32>,
    %c10 = arith.constant 10 : index
    %50 = memref.load %arg0[%c10] : memref<16xi32, #tpu.memory_space<smem>>
    %c0_i32_39 = arith.constant 0 : i32
    %51 = arith.addi %c0_i32_39, %50 : i32
    %52 = arith.index_cast %51 : i32 to index
    %c0_40 = arith.constant 0 : index
    %53 = vector.load %arg2[%52, %c0_40] : memref<560x32xf32, #tpu.memory_space<vmem>>, vector<1x32xf32>
    %c10_41 = arith.constant 10 : index
    %c0_42 = arith.constant 0 : index
    %54 = vector.load %arg6[%c10_41, %c0_42] : memref<16x32xf32, #tpu.memory_space<vmem>>, vector<1x32xf32>
    tpu.vector_store %arg6[%c10_41, %c0_42], %53 {strides = array<i32>} : memref<16x32xf32, #tpu.memory_space<vmem>>, vector<1x32xf32>,
    %c11 = arith.constant 11 : index
    %55 = memref.load %arg0[%c11] : memref<16xi32, #tpu.memory_space<smem>>
    %c0_i32_43 = arith.constant 0 : i32
    %56 = arith.addi %c0_i32_43, %55 : i32
    %57 = arith.index_cast %56 : i32 to index
    %c0_44 = arith.constant 0 : index
    %58 = vector.load %arg2[%57, %c0_44] : memref<560x32xf32, #tpu.memory_space<vmem>>, vector<1x32xf32>
    %c11_45 = arith.constant 11 : index
    %c0_46 = arith.constant 0 : index
    %59 = vector.load %arg6[%c11_45, %c0_46] : memref<16x32xf32, #tpu.memory_space<vmem>>, vector<1x32xf32>
    tpu.vector_store %arg6[%c11_45, %c0_46], %58 {strides = array<i32>} : memref<16x32xf32, #tpu.memory_space<vmem>>, vector<1x32xf32>,
    %c12 = arith.constant 12 : index
    %60 = memref.load %arg0[%c12] : memref<16xi32, #tpu.memory_space<smem>>
    %c0_i32_47 = arith.constant 0 : i32
    %61 = arith.addi %c0_i32_47, %60 : i32
    %62 = arith.index_cast %61 : i32 to index
    %c0_48 = arith.constant 0 : index
    %63 = vector.load %arg2[%62, %c0_48] : memref<560x32xf32, #tpu.memory_space<vmem>>, vector<1x32xf32>
    %c12_49 = arith.constant 12 : index
    %c0_50 = arith.constant 0 : index
    %64 = vector.load %arg6[%c12_49, %c0_50] : memref<16x32xf32, #tpu.memory_space<vmem>>, vector<1x32xf32>
    tpu.vector_store %arg6[%c12_49, %c0_50], %63 {strides = array<i32>} : memref<16x32xf32, #tpu.memory_space<vmem>>, vector<1x32xf32>,
    %c13 = arith.constant 13 : index
    %65 = memref.load %arg0[%c13] : memref<16xi32, #tpu.memory_space<smem>>
    %c0_i32_51 = arith.constant 0 : i32
    %66 = arith.addi %c0_i32_51, %65 : i32
    %67 = arith.index_cast %66 : i32 to index
    %c0_52 = arith.constant 0 : index
    %68 = vector.load %arg2[%67, %c0_52] : memref<560x32xf32, #tpu.memory_space<vmem>>, vector<1x32xf32>
    %c13_53 = arith.constant 13 : index
    %c0_54 = arith.constant 0 : index
    %69 = vector.load %arg6[%c13_53, %c0_54] : memref<16x32xf32, #tpu.memory_space<vmem>>, vector<1x32xf32>
    tpu.vector_store %arg6[%c13_53, %c0_54], %68 {strides = array<i32>} : memref<16x32xf32, #tpu.memory_space<vmem>>, vector<1x32xf32>,
    %c14 = arith.constant 14 : index
    %70 = memref.load %arg0[%c14] : memref<16xi32, #tpu.memory_space<smem>>
    %c0_i32_55 = arith.constant 0 : i32
    %71 = arith.addi %c0_i32_55, %70 : i32
    %72 = arith.index_cast %71 : i32 to index
    %c0_56 = arith.constant 0 : index
    %73 = vector.load %arg2[%72, %c0_56] : memref<560x32xf32, #tpu.memory_space<vmem>>, vector<1x32xf32>
    %c14_57 = arith.constant 14 : index
    %c0_58 = arith.constant 0 : index
    %74 = vector.load %arg6[%c14_57, %c0_58] : memref<16x32xf32, #tpu.memory_space<vmem>>, vector<1x32xf32>
    tpu.vector_store %arg6[%c14_57, %c0_58], %73 {strides = array<i32>} : memref<16x32xf32, #tpu.memory_space<vmem>>, vector<1x32xf32>,
    %c15 = arith.constant 15 : index
    %75 = memref.load %arg0[%c15] : memref<16xi32, #tpu.memory_space<smem>>
    %c0_i32_59 = arith.constant 0 : i32
    %76 = arith.addi %c0_i32_59, %75 : i32
    %77 = arith.index_cast %76 : i32 to index
    %c0_60 = arith.constant 0 : index
    %78 = vector.load %arg2[%77, %c0_60] : memref<560x32xf32, #tpu.memory_space<vmem>>, vector<1x32xf32>
    %c15_61 = arith.constant 15 : index
    %c0_62 = arith.constant 0 : index
    %79 = vector.load %arg6[%c15_61, %c0_62] : memref<16x32xf32, #tpu.memory_space<vmem>>, vector<1x32xf32>
    tpu.vector_store %arg6[%c15_61, %c0_62], %78 {strides = array<i32>} : memref<16x32xf32, #tpu.memory_space<vmem>>, vector<1x32xf32>,
    %c0_63 = arith.constant 0 : index
    %c0_64 = arith.constant 0 : index
    %80 = vector.load %arg6[%c0_63, %c0_64] : memref<16x32xf32, #tpu.memory_space<vmem>>, vector<16x32xf32>
    %81 = vector.shape_cast %80 : vector<16x32xf32> to vector<2x8x32xf32>
    %c104 = arith.constant 104 : index
    %c0_65 = arith.constant 0 : index
    %82 = vector.load %arg2[%c104, %c0_65] : memref<560x32xf32, #tpu.memory_space<vmem>>, vector<8x32xf32>
    %83 = vector.shape_cast %82 : vector<8x32xf32> to vector<1x8x32xf32>
    %84 = vector.broadcast %83 : vector<1x8x32xf32> to vector<2x8x32xf32>
    %85 = arith.addf %81, %84 : vector<2x8x32xf32>
    %c168 = arith.constant 168 : index
    %c0_66 = arith.constant 0 : index
    %86 = vector.load %arg2[%c168, %c0_66] : memref<560x32xf32, #tpu.memory_space<vmem>>, vector<1x32xf32>
    %87 = vector.shape_cast %86 : vector<1x32xf32> to vector<1x1x32xf32>
    %88 = vector.broadcast %87 : vector<1x1x32xf32> to vector<2x8x32xf32>
    %89 = arith.addf %85, %88 : vector<2x8x32xf32>
    %90 = vector.shape_cast %89 : vector<2x8x32xf32> to vector<16x32xf32>
    %c176 = arith.constant 176 : index
    %c0_67 = arith.constant 0 : index
    %91 = vector.load %arg2[%c176, %c0_67] : memref<560x32xf32, #tpu.memory_space<vmem>>, vector<1x32xf32>
    %c184 = arith.constant 184 : index
    %c0_68 = arith.constant 0 : index
    %92 = vector.load %arg2[%c184, %c0_68] : memref<560x32xf32, #tpu.memory_space<vmem>>, vector<1x32xf32>
    %cst = arith.constant dense<0.000000e+00> : vector<16xf32>
    %93 = vector.multi_reduction <add>, %90, %cst [1] : vector<16x32xf32> to vector<16xf32>
    %94 = vector.shape_cast %93 : vector<16xf32> to vector<16x1xf32>
    %cst_69 = arith.constant 3.200000e+01 : f32
    %95 = vector.broadcast %cst_69 : f32 to vector<16x1xf32>
    %96 = arith.divf %94, %95 : vector<16x1xf32>
    %97 = vector.broadcast %96 : vector<16x1xf32> to vector<16x32xf32>
    %98 = arith.subf %90, %97 : vector<16x32xf32>
    %99 = vector.broadcast %96 : vector<16x1xf32> to vector<16x32xf32>
    %100 = arith.subf %90, %99 : vector<16x32xf32>
    %101 = arith.mulf %98, %100 : vector<16x32xf32>
    %cst_70 = arith.constant dense<0.000000e+00> : vector<16xf32>
    %102 = vector.multi_reduction <add>, %101, %cst_70 [1] : vector<16x32xf32> to vector<16xf32>
    %103 = vector.shape_cast %102 : vector<16xf32> to vector<16x1xf32>
    %cst_71 = arith.constant 3.200000e+01 : f32
    %104 = vector.broadcast %cst_71 : f32 to vector<16x1xf32>
    %105 = arith.divf %103, %104 : vector<16x1xf32>
    %106 = vector.broadcast %96 : vector<16x1xf32> to vector<16x32xf32>
    %107 = arith.subf %90, %106 : vector<16x32xf32>
    %cst_72 = arith.constant 9.99999996E-13 : f32
    %108 = vector.broadcast %cst_72 : f32 to vector<16x1xf32>
    %109 = arith.addf %105, %108 : vector<16x1xf32>
    %110 = math.rsqrt %109 : vector<16x1xf32>
    %111 = vector.broadcast %110 : vector<16x1xf32> to vector<16x32xf32>
    %112 = arith.mulf %107, %111 : vector<16x32xf32>
    %113 = vector.broadcast %91 : vector<1x32xf32> to vector<16x32xf32>
    %114 = arith.mulf %112, %113 : vector<16x32xf32>
    %115 = vector.broadcast %92 : vector<1x32xf32> to vector<16x32xf32>
    %116 = arith.addf %114, %115 : vector<16x32xf32>
    %c0_73 = arith.constant 0 : index
    %c0_74 = arith.constant 0 : index
    %117 = vector.load %arg1[%c0_73, %c0_74] : memref<2x12xf32, #tpu.memory_space<vmem>>, vector<2x8xf32>
    %cst_75 = arith.constant 1.000000e+00 : f32
    %118 = vector.broadcast %cst_75 : f32 to vector<2x8xf32>
    %119 = arith.subf %118, %117 : vector<2x8xf32>
    %cst_76 = arith.constant -1.000000e+09 : f32
    %120 = vector.broadcast %cst_76 : f32 to vector<2x8xf32>
    %121 = arith.mulf %119, %120 : vector<2x8xf32>
    %122 = vector.shape_cast %121 : vector<2x8xf32> to vector<2x1x8xf32>
    %c0_77 = arith.constant 0 : index
    %c0_78 = arith.constant 0 : index
    %123 = vector.load %arg3[%c0_77, %c0_78] : memref<80x96xf32, #tpu.memory_space<vmem>>, vector<32x96xf32>
    %c32 = arith.constant 32 : index
    %c0_79 = arith.constant 0 : index
    %124 = vector.load %arg3[%c32, %c0_79] : memref<80x96xf32, #tpu.memory_space<vmem>>, vector<1x96xf32>
    %125 = arith.truncf %116 : vector<16x32xf32> to vector<16x32xbf16>
    %126 = arith.truncf %123 : vector<32x96xf32> to vector<32x96xbf16>
    %cst_80 = arith.constant dense<0.000000e+00> : vector<16x96xf32>
    %127 = tpu.matmul %125, %126, %cst_80 {dimension_numbers = #tpu.dot_dimension_numbers<[1], [0], [0], [1], [0, 0, 1, 1], [], []>} : vector<16x32xbf16>, vector<32x96xbf16>, vector<16x96xf32> -> vector<16x96xf32>
    %128 = vector.broadcast %124 : vector<1x96xf32> to vector<16x96xf32>
    %129 = arith.addf %127, %128 : vector<16x96xf32>
    %130 = vector.shape_cast %129 : vector<16x96xf32> to vector<2x8x96xf32>
    %131 = vector.extract_strided_slice %130 {offsets = [0, 0, 0], sizes = [2, 8, 16], strides = [1, 1, 1]} : vector<2x8x96xf32> to vector<2x8x16xf32>
    %132 = vector.extract_strided_slice %130 {offsets = [0, 0, 32], sizes = [2, 8, 16], strides = [1, 1, 1]} : vector<2x8x96xf32> to vector<2x8x16xf32>
    %133 = vector.extract_strided_slice %130 {offsets = [0, 0, 64], sizes = [2, 8, 16], strides = [1, 1, 1]} : vector<2x8x96xf32> to vector<2x8x16xf32>
    %134 = arith.truncf %131 : vector<2x8x16xf32> to vector<2x8x16xbf16>
    %135 = arith.truncf %132 : vector<2x8x16xf32> to vector<2x8x16xbf16>
    "tpu.trace_start"() <{level = 10 : i32, message = "bqd,bkd->bqk"}> : () -> ()
    %cst_81 = arith.constant dense<0.000000e+00> : vector<2x8x8xf32>
    %136 = tpu.matmul %134, %135, %cst_81 {dimension_numbers = #tpu.dot_dimension_numbers<[2], [2], [1], [1], [0, 0, 0, 1, 1, 1], [0], [0]>} : vector<2x8x16xbf16>, vector<2x8x16xbf16>, vector<2x8x8xf32> -> vector<2x8x8xf32>
    "tpu.trace_stop"() : () -> ()
    %137 = vector.broadcast %122 : vector<2x1x8xf32> to vector<2x8x8xf32>
    %138 = arith.addf %136, %137 : vector<2x8x8xf32>
    %cst_82 = arith.constant dense<0xFF800000> : vector<2x8xf32>
    %139 = vector.multi_reduction <maximumf>, %138, %cst_82 [2] : vector<2x8x8xf32> to vector<2x8xf32>
    %140 = vector.shape_cast %139 : vector<2x8xf32> to vector<2x8x1xf32>
    %141 = vector.broadcast %140 : vector<2x8x1xf32> to vector<2x8x8xf32>
    %142 = arith.subf %138, %141 : vector<2x8x8xf32>
    %143 = math.exp %142 : vector<2x8x8xf32>
    %cst_83 = arith.constant dense<0.000000e+00> : vector<2x8xf32>
    %144 = vector.multi_reduction <add>, %143, %cst_83 [2] : vector<2x8x8xf32> to vector<2x8xf32>
    %145 = vector.shape_cast %144 : vector<2x8xf32> to vector<2x8x1xf32>
    %146 = tpu.reciprocal %145 {approx = true} : vector<2x8x1xf32> -> vector<2x8x1xf32>
    %147 = vector.broadcast %146 : vector<2x8x1xf32> to vector<2x8x8xf32>
    %148 = arith.mulf %143, %147 : vector<2x8x8xf32>
    %149 = arith.truncf %148 : vector<2x8x8xf32> to vector<2x8x8xbf16>
    %150 = arith.truncf %133 : vector<2x8x16xf32> to vector<2x8x16xbf16>
    "tpu.trace_start"() <{level = 10 : i32, message = "bqk,bkd->bqd"}> : () -> ()
    %cst_84 = arith.constant dense<0.000000e+00> : vector<2x8x16xf32>
    %151 = tpu.matmul %149, %150, %cst_84 {dimension_numbers = #tpu.dot_dimension_numbers<[2], [1], [1], [2], [0, 0, 0, 1, 1, 2], [0], [0]>} : vector<2x8x8xbf16>, vector<2x8x16xbf16>, vector<2x8x16xf32> -> vector<2x8x16xf32>
    "tpu.trace_stop"() : () -> ()
    %152 = vector.shape_cast %151 : vector<2x8x16xf32> to vector<16x16xf32>
    %c0_85 = arith.constant 0 : index
    %c0_86 = arith.constant 0 : index
    %153 = vector.load %arg6[%c0_85, %c0_86] : memref<16x32xf32, #tpu.memory_space<vmem>>, vector<16x16xf32>
    tpu.vector_store %arg6[%c0_85, %c0_86], %152 {strides = array<i32>} : memref<16x32xf32, #tpu.memory_space<vmem>>, vector<16x16xf32>,
    %154 = vector.extract_strided_slice %130 {offsets = [0, 0, 16], sizes = [2, 8, 16], strides = [1, 1, 1]} : vector<2x8x96xf32> to vector<2x8x16xf32>
    %155 = vector.extract_strided_slice %130 {offsets = [0, 0, 48], sizes = [2, 8, 16], strides = [1, 1, 1]} : vector<2x8x96xf32> to vector<2x8x16xf32>
    %156 = vector.extract_strided_slice %130 {offsets = [0, 0, 80], sizes = [2, 8, 16], strides = [1, 1, 1]} : vector<2x8x96xf32> to vector<2x8x16xf32>
    %157 = arith.truncf %154 : vector<2x8x16xf32> to vector<2x8x16xbf16>
    %158 = arith.truncf %155 : vector<2x8x16xf32> to vector<2x8x16xbf16>
    "tpu.trace_start"() <{level = 10 : i32, message = "bqd,bkd->bqk"}> : () -> ()
    %cst_87 = arith.constant dense<0.000000e+00> : vector<2x8x8xf32>
    %159 = tpu.matmul %157, %158, %cst_87 {dimension_numbers = #tpu.dot_dimension_numbers<[2], [2], [1], [1], [0, 0, 0, 1, 1, 1], [0], [0]>} : vector<2x8x16xbf16>, vector<2x8x16xbf16>, vector<2x8x8xf32> -> vector<2x8x8xf32>
    "tpu.trace_stop"() : () -> ()
    %160 = vector.broadcast %122 : vector<2x1x8xf32> to vector<2x8x8xf32>
    %161 = arith.addf %159, %160 : vector<2x8x8xf32>
    %cst_88 = arith.constant dense<0xFF800000> : vector<2x8xf32>
    %162 = vector.multi_reduction <maximumf>, %161, %cst_88 [2] : vector<2x8x8xf32> to vector<2x8xf32>
    %163 = vector.shape_cast %162 : vector<2x8xf32> to vector<2x8x1xf32>
    %164 = vector.broadcast %163 : vector<2x8x1xf32> to vector<2x8x8xf32>
    %165 = arith.subf %161, %164 : vector<2x8x8xf32>
    %166 = math.exp %165 : vector<2x8x8xf32>
    %cst_89 = arith.constant dense<0.000000e+00> : vector<2x8xf32>
    %167 = vector.multi_reduction <add>, %166, %cst_89 [2] : vector<2x8x8xf32> to vector<2x8xf32>
    %168 = vector.shape_cast %167 : vector<2x8xf32> to vector<2x8x1xf32>
    %169 = tpu.reciprocal %168 {approx = true} : vector<2x8x1xf32> -> vector<2x8x1xf32>
    %170 = vector.broadcast %169 : vector<2x8x1xf32> to vector<2x8x8xf32>
    %171 = arith.mulf %166, %170 : vector<2x8x8xf32>
    %172 = arith.truncf %171 : vector<2x8x8xf32> to vector<2x8x8xbf16>
    %173 = arith.truncf %156 : vector<2x8x16xf32> to vector<2x8x16xbf16>
    "tpu.trace_start"() <{level = 10 : i32, message = "bqk,bkd->bqd"}> : () -> ()
    %cst_90 = arith.constant dense<0.000000e+00> : vector<2x8x16xf32>
    %174 = tpu.matmul %172, %173, %cst_90 {dimension_numbers = #tpu.dot_dimension_numbers<[2], [1], [1], [2], [0, 0, 0, 1, 1, 2], [0], [0]>} : vector<2x8x8xbf16>, vector<2x8x16xbf16>, vector<2x8x16xf32> -> vector<2x8x16xf32>
    "tpu.trace_stop"() : () -> ()
    %175 = vector.shape_cast %174 : vector<2x8x16xf32> to vector<16x16xf32>
    %c0_91 = arith.constant 0 : index
    %c16 = arith.constant 16 : index
    %176 = vector.load %arg6[%c0_91, %c16] : memref<16x32xf32, #tpu.memory_space<vmem>>, vector<16x16xf32>
    tpu.vector_store %arg6[%c0_91, %c16], %175 {strides = array<i32>} : memref<16x32xf32, #tpu.memory_space<vmem>>, vector<16x16xf32>,
    %c0_92 = arith.constant 0 : index
    %c0_93 = arith.constant 0 : index
    %177 = vector.load %arg6[%c0_92, %c0_93] : memref<16x32xf32, #tpu.memory_space<vmem>>, vector<16x32xf32>
    %c192 = arith.constant 192 : index
    %c0_94 = arith.constant 0 : index
    %178 = vector.load %arg2[%c192, %c0_94] : memref<560x32xf32, #tpu.memory_space<vmem>>, vector<32x32xf32>
    %179 = arith.truncf %177 : vector<16x32xf32> to vector<16x32xbf16>
    %180 = arith.truncf %178 : vector<32x32xf32> to vector<32x32xbf16>
    %cst_95 = arith.constant dense<0.000000e+00> : vector<16x32xf32>
    %181 = tpu.matmul %179, %180, %cst_95 {dimension_numbers = #tpu.dot_dimension_numbers<[1], [0], [0], [1], [0, 0, 1, 1], [], []>} : vector<16x32xbf16>, vector<32x32xbf16>, vector<16x32xf32> -> vector<16x32xf32>
    %c224 = arith.constant 224 : index
    %c0_96 = arith.constant 0 : index
    %182 = vector.load %arg2[%c224, %c0_96] : memref<560x32xf32, #tpu.memory_space<vmem>>, vector<1x32xf32>
    %183 = vector.broadcast %182 : vector<1x32xf32> to vector<16x32xf32>
    %184 = arith.addf %181, %183 : vector<16x32xf32>
    %185 = arith.addf %184, %116 : vector<16x32xf32>
    %c232 = arith.constant 232 : index
    %c0_97 = arith.constant 0 : index
    %186 = vector.load %arg2[%c232, %c0_97] : memref<560x32xf32, #tpu.memory_space<vmem>>, vector<1x32xf32>
    %c240 = arith.constant 240 : index
    %c0_98 = arith.constant 0 : index
    %187 = vector.load %arg2[%c240, %c0_98] : memref<560x32xf32, #tpu.memory_space<vmem>>, vector<1x32xf32>
    %cst_99 = arith.constant dense<0.000000e+00> : vector<16xf32>
    %188 = vector.multi_reduction <add>, %185, %cst_99 [1] : vector<16x32xf32> to vector<16xf32>
    %189 = vector.shape_cast %188 : vector<16xf32> to vector<16x1xf32>
    %cst_100 = arith.constant 3.200000e+01 : f32
    %190 = vector.broadcast %cst_100 : f32 to vector<16x1xf32>
    %191 = arith.divf %189, %190 : vector<16x1xf32>
    %192 = vector.broadcast %191 : vector<16x1xf32> to vector<16x32xf32>
    %193 = arith.subf %185, %192 : vector<16x32xf32>
    %194 = vector.broadcast %191 : vector<16x1xf32> to vector<16x32xf32>
    %195 = arith.subf %185, %194 : vector<16x32xf32>
    %196 = arith.mulf %193, %195 : vector<16x32xf32>
    %cst_101 = arith.constant dense<0.000000e+00> : vector<16xf32>
    %197 = vector.multi_reduction <add>, %196, %cst_101 [1] : vector<16x32xf32> to vector<16xf32>
    %198 = vector.shape_cast %197 : vector<16xf32> to vector<16x1xf32>
    %cst_102 = arith.constant 3.200000e+01 : f32
    %199 = vector.broadcast %cst_102 : f32 to vector<16x1xf32>
    %200 = arith.divf %198, %199 : vector<16x1xf32>
    %201 = vector.broadcast %191 : vector<16x1xf32> to vector<16x32xf32>
    %202 = arith.subf %185, %201 : vector<16x32xf32>
    %cst_103 = arith.constant 9.99999996E-13 : f32
    %203 = vector.broadcast %cst_103 : f32 to vector<16x1xf32>
    %204 = arith.addf %200, %203 : vector<16x1xf32>
    %205 = math.rsqrt %204 : vector<16x1xf32>
    %206 = vector.broadcast %205 : vector<16x1xf32> to vector<16x32xf32>
    %207 = arith.mulf %202, %206 : vector<16x32xf32>
    %208 = vector.broadcast %186 : vector<1x32xf32> to vector<16x32xf32>
    %209 = arith.mulf %207, %208 : vector<16x32xf32>
    %210 = vector.broadcast %187 : vector<1x32xf32> to vector<16x32xf32>
    %211 = arith.addf %209, %210 : vector<16x32xf32>
    %c0_104 = arith.constant 0 : index
    %c0_105 = arith.constant 0 : index
    %212 = vector.load %arg4[%c0_104, %c0_105] : memref<80x64xf32, #tpu.memory_space<vmem>>, vector<32x64xf32>
    %c32_106 = arith.constant 32 : index
    %c0_107 = arith.constant 0 : index
    %213 = vector.load %arg4[%c32_106, %c0_107] : memref<80x64xf32, #tpu.memory_space<vmem>>, vector<1x64xf32>
    %214 = arith.truncf %211 : vector<16x32xf32> to vector<16x32xbf16>
    %215 = arith.truncf %212 : vector<32x64xf32> to vector<32x64xbf16>
    %cst_108 = arith.constant dense<0.000000e+00> : vector<16x64xf32>
    %216 = tpu.matmul %214, %215, %cst_108 {dimension_numbers = #tpu.dot_dimension_numbers<[1], [0], [0], [1], [0, 0, 1, 1], [], []>} : vector<16x32xbf16>, vector<32x64xbf16>, vector<16x64xf32> -> vector<16x64xf32>
    %217 = vector.broadcast %213 : vector<1x64xf32> to vector<16x64xf32>
    %218 = arith.addf %216, %217 : vector<16x64xf32>
    %cst_109 = arith.constant 5.000000e-01 : f32
    %219 = vector.broadcast %cst_109 : f32 to vector<16x64xf32>
    %220 = arith.mulf %219, %218 : vector<16x64xf32>
    %cst_110 = arith.constant 4.471500e-02 : f32
    %221 = vector.broadcast %cst_110 : f32 to vector<16x64xf32>
    %222 = arith.mulf %221, %218 : vector<16x64xf32>
    %223 = arith.mulf %222, %218 : vector<16x64xf32>
    %224 = arith.mulf %223, %218 : vector<16x64xf32>
    %225 = arith.addf %218, %224 : vector<16x64xf32>
    %cst_111 = arith.constant 0.797884583 : f32
    %226 = vector.broadcast %cst_111 : f32 to vector<16x64xf32>
    %227 = arith.mulf %226, %225 : vector<16x64xf32>
    %228 = math.tanh %227 : vector<16x64xf32>
    %cst_112 = arith.constant 1.000000e+00 : f32
    %229 = vector.broadcast %cst_112 : f32 to vector<16x64xf32>
    %230 = arith.addf %229, %228 : vector<16x64xf32>
    %231 = arith.mulf %220, %230 : vector<16x64xf32>
    %c248 = arith.constant 248 : index
    %c0_113 = arith.constant 0 : index
    %232 = vector.load %arg2[%c248, %c0_113] : memref<560x32xf32, #tpu.memory_space<vmem>>, vector<64x32xf32>
    %233 = arith.truncf %231 : vector<16x64xf32> to vector<16x64xbf16>
    %234 = arith.truncf %232 : vector<64x32xf32> to vector<64x32xbf16>
    %cst_114 = arith.constant dense<0.000000e+00> : vector<16x32xf32>
    %235 = tpu.matmul %233, %234, %cst_114 {dimension_numbers = #tpu.dot_dimension_numbers<[1], [0], [0], [1], [0, 0, 1, 1], [], []>} : vector<16x64xbf16>, vector<64x32xbf16>, vector<16x32xf32> -> vector<16x32xf32>
    %c312 = arith.constant 312 : index
    %c0_115 = arith.constant 0 : index
    %236 = vector.load %arg2[%c312, %c0_115] : memref<560x32xf32, #tpu.memory_space<vmem>>, vector<1x32xf32>
    %237 = vector.broadcast %236 : vector<1x32xf32> to vector<16x32xf32>
    %238 = arith.addf %235, %237 : vector<16x32xf32>
    %239 = arith.addf %238, %211 : vector<16x32xf32>
    %c320 = arith.constant 320 : index
    %c0_116 = arith.constant 0 : index
    %240 = vector.load %arg2[%c320, %c0_116] : memref<560x32xf32, #tpu.memory_space<vmem>>, vector<1x32xf32>
    %c328 = arith.constant 328 : index
    %c0_117 = arith.constant 0 : index
    %241 = vector.load %arg2[%c328, %c0_117] : memref<560x32xf32, #tpu.memory_space<vmem>>, vector<1x32xf32>
    %cst_118 = arith.constant dense<0.000000e+00> : vector<16xf32>
    %242 = vector.multi_reduction <add>, %239, %cst_118 [1] : vector<16x32xf32> to vector<16xf32>
    %243 = vector.shape_cast %242 : vector<16xf32> to vector<16x1xf32>
    %cst_119 = arith.constant 3.200000e+01 : f32
    %244 = vector.broadcast %cst_119 : f32 to vector<16x1xf32>
    %245 = arith.divf %243, %244 : vector<16x1xf32>
    %246 = vector.broadcast %245 : vector<16x1xf32> to vector<16x32xf32>
    %247 = arith.subf %239, %246 : vector<16x32xf32>
    %248 = vector.broadcast %245 : vector<16x1xf32> to vector<16x32xf32>
    %249 = arith.subf %239, %248 : vector<16x32xf32>
    %250 = arith.mulf %247, %249 : vector<16x32xf32>
    %cst_120 = arith.constant dense<0.000000e+00> : vector<16xf32>
    %251 = vector.multi_reduction <add>, %250, %cst_120 [1] : vector<16x32xf32> to vector<16xf32>
    %252 = vector.shape_cast %251 : vector<16xf32> to vector<16x1xf32>
    %cst_121 = arith.constant 3.200000e+01 : f32
    %253 = vector.broadcast %cst_121 : f32 to vector<16x1xf32>
    %254 = arith.divf %252, %253 : vector<16x1xf32>
    %255 = vector.broadcast %245 : vector<16x1xf32> to vector<16x32xf32>
    %256 = arith.subf %239, %255 : vector<16x32xf32>
    %cst_122 = arith.constant 9.99999996E-13 : f32
    %257 = vector.broadcast %cst_122 : f32 to vector<16x1xf32>
    %258 = arith.addf %254, %257 : vector<16x1xf32>
    %259 = math.rsqrt %258 : vector<16x1xf32>
    %260 = vector.broadcast %259 : vector<16x1xf32> to vector<16x32xf32>
    %261 = arith.mulf %256, %260 : vector<16x32xf32>
    %262 = vector.broadcast %240 : vector<1x32xf32> to vector<16x32xf32>
    %263 = arith.mulf %261, %262 : vector<16x32xf32>
    %264 = vector.broadcast %241 : vector<1x32xf32> to vector<16x32xf32>
    %265 = arith.addf %263, %264 : vector<16x32xf32>
    %c40 = arith.constant 40 : index
    %c0_123 = arith.constant 0 : index
    %266 = vector.load %arg3[%c40, %c0_123] : memref<80x96xf32, #tpu.memory_space<vmem>>, vector<32x96xf32>
    %c72 = arith.constant 72 : index
    %c0_124 = arith.constant 0 : index
    %267 = vector.load %arg3[%c72, %c0_124] : memref<80x96xf32, #tpu.memory_space<vmem>>, vector<1x96xf32>
    %268 = arith.truncf %265 : vector<16x32xf32> to vector<16x32xbf16>
    %269 = arith.truncf %266 : vector<32x96xf32> to vector<32x96xbf16>
    %cst_125 = arith.constant dense<0.000000e+00> : vector<16x96xf32>
    %270 = tpu.matmul %268, %269, %cst_125 {dimension_numbers = #tpu.dot_dimension_numbers<[1], [0], [0], [1], [0, 0, 1, 1], [], []>} : vector<16x32xbf16>, vector<32x96xbf16>, vector<16x96xf32> -> vector<16x96xf32>
    %271 = vector.broadcast %267 : vector<1x96xf32> to vector<16x96xf32>
    %272 = arith.addf %270, %271 : vector<16x96xf32>
    %273 = vector.shape_cast %272 : vector<16x96xf32> to vector<2x8x96xf32>
    %274 = vector.extract_strided_slice %273 {offsets = [0, 0, 0], sizes = [2, 8, 16], strides = [1, 1, 1]} : vector<2x8x96xf32> to vector<2x8x16xf32>
    %275 = vector.extract_strided_slice %273 {offsets = [0, 0, 32], sizes = [2, 8, 16], strides = [1, 1, 1]} : vector<2x8x96xf32> to vector<2x8x16xf32>
    %276 = vector.extract_strided_slice %273 {offsets = [0, 0, 64], sizes = [2, 8, 16], strides = [1, 1, 1]} : vector<2x8x96xf32> to vector<2x8x16xf32>
    %277 = arith.truncf %274 : vector<2x8x16xf32> to vector<2x8x16xbf16>
    %278 = arith.truncf %275 : vector<2x8x16xf32> to vector<2x8x16xbf16>
    "tpu.trace_start"() <{level = 10 : i32, message = "bqd,bkd->bqk"}> : () -> ()
    %cst_126 = arith.constant dense<0.000000e+00> : vector<2x8x8xf32>
    %279 = tpu.matmul %277, %278, %cst_126 {dimension_numbers = #tpu.dot_dimension_numbers<[2], [2], [1], [1], [0, 0, 0, 1, 1, 1], [0], [0]>} : vector<2x8x16xbf16>, vector<2x8x16xbf16>, vector<2x8x8xf32> -> vector<2x8x8xf32>
    "tpu.trace_stop"() : () -> ()
    %280 = vector.broadcast %122 : vector<2x1x8xf32> to vector<2x8x8xf32>
    %281 = arith.addf %279, %280 : vector<2x8x8xf32>
    %cst_127 = arith.constant dense<0xFF800000> : vector<2x8xf32>
    %282 = vector.multi_reduction <maximumf>, %281, %cst_127 [2] : vector<2x8x8xf32> to vector<2x8xf32>
    %283 = vector.shape_cast %282 : vector<2x8xf32> to vector<2x8x1xf32>
    %284 = vector.broadcast %283 : vector<2x8x1xf32> to vector<2x8x8xf32>
    %285 = arith.subf %281, %284 : vector<2x8x8xf32>
    %286 = math.exp %285 : vector<2x8x8xf32>
    %cst_128 = arith.constant dense<0.000000e+00> : vector<2x8xf32>
    %287 = vector.multi_reduction <add>, %286, %cst_128 [2] : vector<2x8x8xf32> to vector<2x8xf32>
    %288 = vector.shape_cast %287 : vector<2x8xf32> to vector<2x8x1xf32>
    %289 = tpu.reciprocal %288 {approx = true} : vector<2x8x1xf32> -> vector<2x8x1xf32>
    %290 = vector.broadcast %289 : vector<2x8x1xf32> to vector<2x8x8xf32>
    %291 = arith.mulf %286, %290 : vector<2x8x8xf32>
    %292 = arith.truncf %291 : vector<2x8x8xf32> to vector<2x8x8xbf16>
    %293 = arith.truncf %276 : vector<2x8x16xf32> to vector<2x8x16xbf16>
    "tpu.trace_start"() <{level = 10 : i32, message = "bqk,bkd->bqd"}> : () -> ()
    %cst_129 = arith.constant dense<0.000000e+00> : vector<2x8x16xf32>
    %294 = tpu.matmul %292, %293, %cst_129 {dimension_numbers = #tpu.dot_dimension_numbers<[2], [1], [1], [2], [0, 0, 0, 1, 1, 2], [0], [0]>} : vector<2x8x8xbf16>, vector<2x8x16xbf16>, vector<2x8x16xf32> -> vector<2x8x16xf32>
    "tpu.trace_stop"() : () -> ()
    %295 = vector.shape_cast %294 : vector<2x8x16xf32> to vector<16x16xf32>
    %c0_130 = arith.constant 0 : index
    %c0_131 = arith.constant 0 : index
    %296 = vector.load %arg6[%c0_130, %c0_131] : memref<16x32xf32, #tpu.memory_space<vmem>>, vector<16x16xf32>
    tpu.vector_store %arg6[%c0_130, %c0_131], %295 {strides = array<i32>} : memref<16x32xf32, #tpu.memory_space<vmem>>, vector<16x16xf32>,
    %297 = vector.extract_strided_slice %273 {offsets = [0, 0, 16], sizes = [2, 8, 16], strides = [1, 1, 1]} : vector<2x8x96xf32> to vector<2x8x16xf32>
    %298 = vector.extract_strided_slice %273 {offsets = [0, 0, 48], sizes = [2, 8, 16], strides = [1, 1, 1]} : vector<2x8x96xf32> to vector<2x8x16xf32>
    %299 = vector.extract_strided_slice %273 {offsets = [0, 0, 80], sizes = [2, 8, 16], strides = [1, 1, 1]} : vector<2x8x96xf32> to vector<2x8x16xf32>
    %300 = arith.truncf %297 : vector<2x8x16xf32> to vector<2x8x16xbf16>
    %301 = arith.truncf %298 : vector<2x8x16xf32> to vector<2x8x16xbf16>
    "tpu.trace_start"() <{level = 10 : i32, message = "bqd,bkd->bqk"}> : () -> ()
    %cst_132 = arith.constant dense<0.000000e+00> : vector<2x8x8xf32>
    %302 = tpu.matmul %300, %301, %cst_132 {dimension_numbers = #tpu.dot_dimension_numbers<[2], [2], [1], [1], [0, 0, 0, 1, 1, 1], [0], [0]>} : vector<2x8x16xbf16>, vector<2x8x16xbf16>, vector<2x8x8xf32> -> vector<2x8x8xf32>
    "tpu.trace_stop"() : () -> ()
    %303 = vector.broadcast %122 : vector<2x1x8xf32> to vector<2x8x8xf32>
    %304 = arith.addf %302, %303 : vector<2x8x8xf32>
    %cst_133 = arith.constant dense<0xFF800000> : vector<2x8xf32>
    %305 = vector.multi_reduction <maximumf>, %304, %cst_133 [2] : vector<2x8x8xf32> to vector<2x8xf32>
    %306 = vector.shape_cast %305 : vector<2x8xf32> to vector<2x8x1xf32>
    %307 = vector.broadcast %306 : vector<2x8x1xf32> to vector<2x8x8xf32>
    %308 = arith.subf %304, %307 : vector<2x8x8xf32>
    %309 = math.exp %308 : vector<2x8x8xf32>
    %cst_134 = arith.constant dense<0.000000e+00> : vector<2x8xf32>
    %310 = vector.multi_reduction <add>, %309, %cst_134 [2] : vector<2x8x8xf32> to vector<2x8xf32>
    %311 = vector.shape_cast %310 : vector<2x8xf32> to vector<2x8x1xf32>
    %312 = tpu.reciprocal %311 {approx = true} : vector<2x8x1xf32> -> vector<2x8x1xf32>
    %313 = vector.broadcast %312 : vector<2x8x1xf32> to vector<2x8x8xf32>
    %314 = arith.mulf %309, %313 : vector<2x8x8xf32>
    %315 = arith.truncf %314 : vector<2x8x8xf32> to vector<2x8x8xbf16>
    %316 = arith.truncf %299 : vector<2x8x16xf32> to vector<2x8x16xbf16>
    "tpu.trace_start"() <{level = 10 : i32, message = "bqk,bkd->bqd"}> : () -> ()
    %cst_135 = arith.constant dense<0.000000e+00> : vector<2x8x16xf32>
    %317 = tpu.matmul %315, %316, %cst_135 {dimension_numbers = #tpu.dot_dimension_numbers<[2], [1], [1], [2], [0, 0, 0, 1, 1, 2], [0], [0]>} : vector<2x8x8xbf16>, vector<2x8x16xbf16>, vector<2x8x16xf32> -> vector<2x8x16xf32>
    "tpu.trace_stop"() : () -> ()
    %318 = vector.shape_cast %317 : vector<2x8x16xf32> to vector<16x16xf32>
    %c0_136 = arith.constant 0 : index
    %c16_137 = arith.constant 16 : index
    %319 = vector.load %arg6[%c0_136, %c16_137] : memref<16x32xf32, #tpu.memory_space<vmem>>, vector<16x16xf32>
    tpu.vector_store %arg6[%c0_136, %c16_137], %318 {strides = array<i32>} : memref<16x32xf32, #tpu.memory_space<vmem>>, vector<16x16xf32>,
    %c0_138 = arith.constant 0 : index
    %c0_139 = arith.constant 0 : index
    %320 = vector.load %arg6[%c0_138, %c0_139] : memref<16x32xf32, #tpu.memory_space<vmem>>, vector<16x32xf32>
    %c336 = arith.constant 336 : index
    %c0_140 = arith.constant 0 : index
    %321 = vector.load %arg2[%c336, %c0_140] : memref<560x32xf32, #tpu.memory_space<vmem>>, vector<32x32xf32>
    %322 = arith.truncf %320 : vector<16x32xf32> to vector<16x32xbf16>
    %323 = arith.truncf %321 : vector<32x32xf32> to vector<32x32xbf16>
    %cst_141 = arith.constant dense<0.000000e+00> : vector<16x32xf32>
    %324 = tpu.matmul %322, %323, %cst_141 {dimension_numbers = #tpu.dot_dimension_numbers<[1], [0], [0], [1], [0, 0, 1, 1], [], []>} : vector<16x32xbf16>, vector<32x32xbf16>, vector<16x32xf32> -> vector<16x32xf32>
    %c368 = arith.constant 368 : index
    %c0_142 = arith.constant 0 : index
    %325 = vector.load %arg2[%c368, %c0_142] : memref<560x32xf32, #tpu.memory_space<vmem>>, vector<1x32xf32>
    %326 = vector.broadcast %325 : vector<1x32xf32> to vector<16x32xf32>
    %327 = arith.addf %324, %326 : vector<16x32xf32>
    %328 = arith.addf %327, %265 : vector<16x32xf32>
    %c376 = arith.constant 376 : index
    %c0_143 = arith.constant 0 : index
    %329 = vector.load %arg2[%c376, %c0_143] : memref<560x32xf32, #tpu.memory_space<vmem>>, vector<1x32xf32>
    %c384 = arith.constant 384 : index
    %c0_144 = arith.constant 0 : index
    %330 = vector.load %arg2[%c384, %c0_144] : memref<560x32xf32, #tpu.memory_space<vmem>>, vector<1x32xf32>
    %cst_145 = arith.constant dense<0.000000e+00> : vector<16xf32>
    %331 = vector.multi_reduction <add>, %328, %cst_145 [1] : vector<16x32xf32> to vector<16xf32>
    %332 = vector.shape_cast %331 : vector<16xf32> to vector<16x1xf32>
    %cst_146 = arith.constant 3.200000e+01 : f32
    %333 = vector.broadcast %cst_146 : f32 to vector<16x1xf32>
    %334 = arith.divf %332, %333 : vector<16x1xf32>
    %335 = vector.broadcast %334 : vector<16x1xf32> to vector<16x32xf32>
    %336 = arith.subf %328, %335 : vector<16x32xf32>
    %337 = vector.broadcast %334 : vector<16x1xf32> to vector<16x32xf32>
    %338 = arith.subf %328, %337 : vector<16x32xf32>
    %339 = arith.mulf %336, %338 : vector<16x32xf32>
    %cst_147 = arith.constant dense<0.000000e+00> : vector<16xf32>
    %340 = vector.multi_reduction <add>, %339, %cst_147 [1] : vector<16x32xf32> to vector<16xf32>
    %341 = vector.shape_cast %340 : vector<16xf32> to vector<16x1xf32>
    %cst_148 = arith.constant 3.200000e+01 : f32
    %342 = vector.broadcast %cst_148 : f32 to vector<16x1xf32>
    %343 = arith.divf %341, %342 : vector<16x1xf32>
    %344 = vector.broadcast %334 : vector<16x1xf32> to vector<16x32xf32>
    %345 = arith.subf %328, %344 : vector<16x32xf32>
    %cst_149 = arith.constant 9.99999996E-13 : f32
    %346 = vector.broadcast %cst_149 : f32 to vector<16x1xf32>
    %347 = arith.addf %343, %346 : vector<16x1xf32>
    %348 = math.rsqrt %347 : vector<16x1xf32>
    %349 = vector.broadcast %348 : vector<16x1xf32> to vector<16x32xf32>
    %350 = arith.mulf %345, %349 : vector<16x32xf32>
    %351 = vector.broadcast %329 : vector<1x32xf32> to vector<16x32xf32>
    %352 = arith.mulf %350, %351 : vector<16x32xf32>
    %353 = vector.broadcast %330 : vector<1x32xf32> to vector<16x32xf32>
    %354 = arith.addf %352, %353 : vector<16x32xf32>
    %c40_150 = arith.constant 40 : index
    %c0_151 = arith.constant 0 : index
    %355 = vector.load %arg4[%c40_150, %c0_151] : memref<80x64xf32, #tpu.memory_space<vmem>>, vector<32x64xf32>
    %c72_152 = arith.constant 72 : index
    %c0_153 = arith.constant 0 : index
    %356 = vector.load %arg4[%c72_152, %c0_153] : memref<80x64xf32, #tpu.memory_space<vmem>>, vector<1x64xf32>
    %357 = arith.truncf %354 : vector<16x32xf32> to vector<16x32xbf16>
    %358 = arith.truncf %355 : vector<32x64xf32> to vector<32x64xbf16>
    %cst_154 = arith.constant dense<0.000000e+00> : vector<16x64xf32>
    %359 = tpu.matmul %357, %358, %cst_154 {dimension_numbers = #tpu.dot_dimension_numbers<[1], [0], [0], [1], [0, 0, 1, 1], [], []>} : vector<16x32xbf16>, vector<32x64xbf16>, vector<16x64xf32> -> vector<16x64xf32>
    %360 = vector.broadcast %356 : vector<1x64xf32> to vector<16x64xf32>
    %361 = arith.addf %359, %360 : vector<16x64xf32>
    %cst_155 = arith.constant 5.000000e-01 : f32
    %362 = vector.broadcast %cst_155 : f32 to vector<16x64xf32>
    %363 = arith.mulf %362, %361 : vector<16x64xf32>
    %cst_156 = arith.constant 4.471500e-02 : f32
    %364 = vector.broadcast %cst_156 : f32 to vector<16x64xf32>
    %365 = arith.mulf %364, %361 : vector<16x64xf32>
    %366 = arith.mulf %365, %361 : vector<16x64xf32>
    %367 = arith.mulf %366, %361 : vector<16x64xf32>
    %368 = arith.addf %361, %367 : vector<16x64xf32>
    %cst_157 = arith.constant 0.797884583 : f32
    %369 = vector.broadcast %cst_157 : f32 to vector<16x64xf32>
    %370 = arith.mulf %369, %368 : vector<16x64xf32>
    %371 = math.tanh %370 : vector<16x64xf32>
    %cst_158 = arith.constant 1.000000e+00 : f32
    %372 = vector.broadcast %cst_158 : f32 to vector<16x64xf32>
    %373 = arith.addf %372, %371 : vector<16x64xf32>
    %374 = arith.mulf %363, %373 : vector<16x64xf32>
    %c392 = arith.constant 392 : index
    %c0_159 = arith.constant 0 : index
    %375 = vector.load %arg2[%c392, %c0_159] : memref<560x32xf32, #tpu.memory_space<vmem>>, vector<64x32xf32>
    %376 = arith.truncf %374 : vector<16x64xf32> to vector<16x64xbf16>
    %377 = arith.truncf %375 : vector<64x32xf32> to vector<64x32xbf16>
    %cst_160 = arith.constant dense<0.000000e+00> : vector<16x32xf32>
    %378 = tpu.matmul %376, %377, %cst_160 {dimension_numbers = #tpu.dot_dimension_numbers<[1], [0], [0], [1], [0, 0, 1, 1], [], []>} : vector<16x64xbf16>, vector<64x32xbf16>, vector<16x32xf32> -> vector<16x32xf32>
    %c456 = arith.constant 456 : index
    %c0_161 = arith.constant 0 : index
    %379 = vector.load %arg2[%c456, %c0_161] : memref<560x32xf32, #tpu.memory_space<vmem>>, vector<1x32xf32>
    %380 = vector.broadcast %379 : vector<1x32xf32> to vector<16x32xf32>
    %381 = arith.addf %378, %380 : vector<16x32xf32>
    %382 = arith.addf %381, %354 : vector<16x32xf32>
    %c464 = arith.constant 464 : index
    %c0_162 = arith.constant 0 : index
    %383 = vector.load %arg2[%c464, %c0_162] : memref<560x32xf32, #tpu.memory_space<vmem>>, vector<1x32xf32>
    %c472 = arith.constant 472 : index
    %c0_163 = arith.constant 0 : index
    %384 = vector.load %arg2[%c472, %c0_163] : memref<560x32xf32, #tpu.memory_space<vmem>>, vector<1x32xf32>
    %cst_164 = arith.constant dense<0.000000e+00> : vector<16xf32>
    %385 = vector.multi_reduction <add>, %382, %cst_164 [1] : vector<16x32xf32> to vector<16xf32>
    %386 = vector.shape_cast %385 : vector<16xf32> to vector<16x1xf32>
    %cst_165 = arith.constant 3.200000e+01 : f32
    %387 = vector.broadcast %cst_165 : f32 to vector<16x1xf32>
    %388 = arith.divf %386, %387 : vector<16x1xf32>
    %389 = vector.broadcast %388 : vector<16x1xf32> to vector<16x32xf32>
    %390 = arith.subf %382, %389 : vector<16x32xf32>
    %391 = vector.broadcast %388 : vector<16x1xf32> to vector<16x32xf32>
    %392 = arith.subf %382, %391 : vector<16x32xf32>
    %393 = arith.mulf %390, %392 : vector<16x32xf32>
    %cst_166 = arith.constant dense<0.000000e+00> : vector<16xf32>
    %394 = vector.multi_reduction <add>, %393, %cst_166 [1] : vector<16x32xf32> to vector<16xf32>
    %395 = vector.shape_cast %394 : vector<16xf32> to vector<16x1xf32>
    %cst_167 = arith.constant 3.200000e+01 : f32
    %396 = vector.broadcast %cst_167 : f32 to vector<16x1xf32>
    %397 = arith.divf %395, %396 : vector<16x1xf32>
    %398 = vector.broadcast %388 : vector<16x1xf32> to vector<16x32xf32>
    %399 = arith.subf %382, %398 : vector<16x32xf32>
    %cst_168 = arith.constant 9.99999996E-13 : f32
    %400 = vector.broadcast %cst_168 : f32 to vector<16x1xf32>
    %401 = arith.addf %397, %400 : vector<16x1xf32>
    %402 = math.rsqrt %401 : vector<16x1xf32>
    %403 = vector.broadcast %402 : vector<16x1xf32> to vector<16x32xf32>
    %404 = arith.mulf %399, %403 : vector<16x32xf32>
    %405 = vector.broadcast %383 : vector<1x32xf32> to vector<16x32xf32>
    %406 = arith.mulf %404, %405 : vector<16x32xf32>
    %407 = vector.broadcast %384 : vector<1x32xf32> to vector<16x32xf32>
    %408 = arith.addf %406, %407 : vector<16x32xf32>
    %409 = vector.shape_cast %408 : vector<16x32xf32> to vector<2x8x32xf32>
    %410 = vector.extract_strided_slice %409 {offsets = [0, 0, 0], sizes = [2, 1, 32], strides = [1, 1, 1]} : vector<2x8x32xf32> to vector<2x1x32xf32>
    %411 = vector.shape_cast %410 : vector<2x1x32xf32> to vector<2x32xf32>
    %c480 = arith.constant 480 : index
    %c0_169 = arith.constant 0 : index
    %412 = vector.load %arg2[%c480, %c0_169] : memref<560x32xf32, #tpu.memory_space<vmem>>, vector<32x32xf32>
    %413 = arith.truncf %411 : vector<2x32xf32> to vector<2x32xbf16>
    %414 = arith.truncf %412 : vector<32x32xf32> to vector<32x32xbf16>
    %cst_170 = arith.constant dense<0.000000e+00> : vector<2x32xf32>
    %415 = tpu.matmul %413, %414, %cst_170 {dimension_numbers = #tpu.dot_dimension_numbers<[1], [0], [0], [1], [0, 0, 1, 1], [], []>} : vector<2x32xbf16>, vector<32x32xbf16>, vector<2x32xf32> -> vector<2x32xf32>
    %c512 = arith.constant 512 : index
    %c0_171 = arith.constant 0 : index
    %416 = vector.load %arg2[%c512, %c0_171] : memref<560x32xf32, #tpu.memory_space<vmem>>, vector<1x32xf32>
    %417 = vector.broadcast %416 : vector<1x32xf32> to vector<2x32xf32>
    %418 = arith.addf %415, %417 : vector<2x32xf32>
    %419 = math.tanh %418 : vector<2x32xf32>
    %c520 = arith.constant 520 : index
    %c0_172 = arith.constant 0 : index
    %420 = vector.load %arg2[%c520, %c0_172] : memref<560x32xf32, #tpu.memory_space<vmem>>, vector<32x32xf32>
    %421 = arith.truncf %419 : vector<2x32xf32> to vector<2x32xbf16>
    %422 = arith.truncf %420 : vector<32x32xf32> to vector<32x32xbf16>
    %cst_173 = arith.constant dense<0.000000e+00> : vector<2x32xf32>
    %423 = tpu.matmul %421, %422, %cst_173 {dimension_numbers = #tpu.dot_dimension_numbers<[1], [0], [0], [1], [0, 0, 1, 1], [], []>} : vector<2x32xbf16>, vector<32x32xbf16>, vector<2x32xf32> -> vector<2x32xf32>
    %c552 = arith.constant 552 : index
    %c0_174 = arith.constant 0 : index
    %424 = vector.load %arg2[%c552, %c0_174] : memref<560x32xf32, #tpu.memory_space<vmem>>, vector<1x32xf32>
    %425 = vector.broadcast %424 : vector<1x32xf32> to vector<2x32xf32>
    %426 = arith.addf %423, %425 : vector<2x32xf32>
    %427 = vector.extract_strided_slice %426 {offsets = [0, 0], sizes = [2, 4], strides = [1, 1]} : vector<2x32xf32> to vector<2x4xf32>
    %c0_175 = arith.constant 0 : index
    %c8_176 = arith.constant 8 : index
    %428 = vector.load %arg1[%c0_175, %c8_176] : memref<2x12xf32, #tpu.memory_space<vmem>>, vector<2x4xf32>
    %cst_177 = arith.constant 0.000000e+00 : f32
    %429 = vector.broadcast %cst_177 : f32 to vector<2x4xf32>
    %430 = arith.maximumf %427, %429 : vector<2x4xf32>
    %431 = arith.mulf %427, %428 : vector<2x4xf32>
    %432 = arith.subf %430, %431 : vector<2x4xf32>
    %433 = math.absf %427 : vector<2x4xf32>
    %cst_178 = arith.constant 0.000000e+00 : f32
    %434 = vector.broadcast %cst_178 : f32 to vector<2x4xf32>
    %435 = arith.subf %434, %433 : vector<2x4xf32>
    %436 = math.exp %435 : vector<2x4xf32>
    %cst_179 = arith.constant 1.000000e+00 : f32
    %437 = vector.broadcast %cst_179 : f32 to vector<2x4xf32>
    %438 = arith.addf %437, %436 : vector<2x4xf32>
    %439 = math.log %438 : vector<2x4xf32>
    %440 = arith.addf %432, %439 : vector<2x4xf32>
    %cst_180 = arith.constant dense<0.000000e+00> : vector<2xf32>
    %441 = vector.multi_reduction <add>, %440, %cst_180 [1] : vector<2x4xf32> to vector<2xf32>
    %442 = vector.shape_cast %441 : vector<2xf32> to vector<2x1xf32>
    %cst_181 = arith.constant dense<0.000000e+00> : vector<1xf32>
    %443 = vector.multi_reduction <add>, %442, %cst_181 [0] : vector<2x1xf32> to vector<1xf32>
    %444 = vector.shape_cast %443 : vector<1xf32> to vector<1x1xf32>
    %cst_182 = arith.constant 8.000000e+00 : f32
    %445 = vector.broadcast %cst_182 : f32 to vector<1x1xf32>
    %446 = arith.divf %444, %445 : vector<1x1xf32>
    %cst_183 = arith.constant 0.000000e+00 : f32
    %447 = vector.broadcast %cst_183 : f32 to vector<8x128xf32>
    %c0_184 = arith.constant 0 : index
    %c0_185 = arith.constant 0 : index
    %448 = vector.load %arg5[%c0_184, %c0_185] : memref<8x128xf32, #tpu.memory_space<vmem>>, vector<8x128xf32>
    tpu.vector_store %arg5[%c0_184, %c0_185], %447 {strides = array<i32>} : memref<8x128xf32, #tpu.memory_space<vmem>>, vector<8x128xf32>,
    %c0_186 = arith.constant 0 : index
    %c0_187 = arith.constant 0 : index
    %449 = vector.load %arg5[%c0_186, %c0_187] : memref<8x128xf32, #tpu.memory_space<vmem>>, vector<2x4xf32>
    tpu.vector_store %arg5[%c0_186, %c0_187], %427 {strides = array<i32>} : memref<8x128xf32, #tpu.memory_space<vmem>>, vector<2x4xf32>,
    %c0_188 = arith.constant 0 : index
    %c4_189 = arith.constant 4 : index
    %450 = vector.load %arg5[%c0_188, %c4_189] : memref<8x128xf32, #tpu.memory_space<vmem>>, vector<1x1xf32>
    tpu.vector_store %arg5[%c0_188, %c4_189], %446 {strides = array<i32>} : memref<8x128xf32, #tpu.memory_space<vmem>>, vector<1x1xf32>,
    return
  }
}

</mosaic_0001>

<bundles_post_ra>
// kernel: jiagu_text_bert_forward.1
= control target key start
LH: loop header
LB: loop body
LE: loop exit
PB: predicated region body
PF: predicated region fallthrough
CT: control target
= control target key end

     0   :  { %10 = vsyncpa [#allocation4], 0  ;;  %s2968_s0 = inlined_call_operand.vmem [shape: s32[16], index: 0, kind: input, shape index: {}]   ;;  %s2969_s1 = inlined_call_operand.vmem [shape: f32[2,12], index: 1, kind: input, shape index: {}]   ;;  %s2970_s2 = inlined_call_operand.vmem [shape: f32[560,32], index: 2, kind: input, shape index: {}]   ;;  %s2971_s3 = inlined_call_operand.vmem [shape: f32[80,96], index: 3, kind: input, shape index: {}]   ;;  %s2972_s4 = inlined_call_operand.vmem [shape: f32[80,64], index: 4, kind: input, shape index: {}]   ;;  %s2973_s5 = inlined_call_operand.vmem [shape: f32[8,128], index: 5, kind: output, shape index: {}]  }
   0x1   :  { %s17_s20 = sshll.u32 %s2968_s0, 4  ;;  %s18_s20 = int_to_ptr.vmem [resolvable:$true] %s17_s20 }
   0x2   :  { %s2331_s21 = scalar_lea.vmem %s18_s20, 16  ;;  %p2336_p1 = scmp.lt.s32.totalorder %s18_s20, %s18_s20 }
   0x3   :  { %p2332_p0 = scmp.ne.s32.totalorder %s18_s20, %s2331_s21  ;;  %p2337_p2 = scmp.lt.s32.totalorder %s2331_s21, %s2331_s21 }
   0x5   :  { %p2338_p3 = por %p2337_p2, %p2336_p1 }
   0x7   :  { %p2339_p4 = pnand %p2338_p3, %p2332_p0 }
   0x9   :  { %2342 = shalt.err (!%p2339_p4)
}
   0xa   :  { %s2345_s22 = smov [#allocation3]  }
   0xb   :  { %20 = dma.vmem_to_smem %s18_s20, 16, %s2345_s22, [#allocation4]  }
   0xc   :  { %2343 = dma.done.wait [#allocation4], 16  }
   0xd   :  { %2344 = vsyncadd [#allocation4], 4294967280 }
   0xe   :  { %32 = sfence }
   0xf   :  { %s34_s23 = sld [smem:[#allocation3]]  ;;  %s1941_s24 = sld [smem:[#allocation3 + $0x1]]  ;;  %vm37_vm0 = vcmask 253952   ;;  %v101_v12 = vld [vmem:[%s2970_s2 + $0x68] sm:$0xff]  ;;  %vm113_vm1 = vcmask 261120   ;;  %v179_v36 = vld [vmem:[%s2971_s3] sm:$0xff] }
  0x10   :  { %s1942_s25 = sld [smem:[#allocation3 + $0x2]]  ;;  %s1943_s26 = sld [smem:[#allocation3 + $0x3]]  ;;  %v1956_v14 = vld [vmem:[%s2970_s2 + $0xa8] ss:$0 sm:$0xff]  ;;  %v2346_v39 = vmov 0.0   ;;  %v181_v40 = vld [vmem:[%s2971_s3 + $0x10] sm:$0xff] }
  0x11   :  { %s1944_s27 = sld [smem:[#allocation3 + $0x4]]  ;;  %s1945_s28 = sld [smem:[#allocation3 + $0x5]]  ;;  %v180_v37 = vld [vmem:[%s2971_s3 + $0x8] sm:$0xff]  ;;  %2069 = vmatprep.subr.bf16.mxu0 %v2346_v39  ;;  %1916 = vst [vmem:[%s2973_s5] sm:$0xff] %v2346_v39  ;;  %v182_v41 = vld [vmem:[%s2971_s3 + $0x18] sm:$0xff]  ;;  %2077 = vmatprep.subr.bf16.mxu1 %v2346_v39  ;;  %vm2347_vm2 = vmmov 0   ;;  %vm250_vm3 = vcmask 130048  }
  0x12   :  { %s1946_s0 = sld [smem:[#allocation3 + $0x6]]  ;;  %s1947_s29 = sld [smem:[#allocation3 + $0x7]]  ;;  %v185_v38 = vpack.c.bf16 %v180_v37, %v179_v36  ;;  %v186_v42 = vpack.c.bf16 %v182_v41, %v181_v40  ;;  %2073 = vmatprep.mubr.msk.bf16.mxu0 %vm2347_vm2, %v2346_v39  ;;  %2079 = vmatprep.mubr.msk.bf16.mxu1 %vm2347_vm2, %v2346_v39  ;;  %v1957_v51 = vld [vmem:[%s2970_s2 + $0xb0] ss:$0 sm:$0xff]  ;;  %v1958_v55 = vld [vmem:[%s2970_s2 + $0xb8] ss:$0 sm:$0xff] }
  0x13   :  { %s2389_s30 = sld [smem:[#allocation3 + $0x8]]  ;;  %s2391_s6 = sld [smem:[#allocation3 + $0x9]]  ;;  %v1959_v60 = vld [vmem:[%s2971_s3 + $0x20] ss:$0 sm:$0xff]  ;;  %vm346_vm4 = vcmask 64512   ;;  %vm376_vm5 = vcmask 1043456  }
  0x14   :  { %s2393_s7 = sld [smem:[#allocation3 + $0xa]]  ;;  %s2395_s8 = sld [smem:[#allocation3 + $0xb]]  ;;  %2070 = vmatpush3.bf16.msra.mxu0 %v185_v38  ;;  %vm698_vm6 = vcmask 261248   ;;  %vm893_vm7 = vcmask 523264   ;;  %vm1784_vm8 = vcmask 1041409   ;;  %vm1902_vm9 = vcmask 25600  }
  0x15   :  { %s35_s11 = scalar_lea.vmem %s2970_s2, %s34_s23  ;;  %s40_s14 = scalar_lea.vmem %s2970_s2, %s1941_s24  ;;  %2071 = vmatprep.subr.bf16.mxu0 %v2346_v39  ;;  %vm1906_vm10 = vcmask 1041408   ;;  %vm1918_vm11 = vcmask 32800  }
  0x16   :  { %v36_v0 = vld [vmem:[%s35_s11] sm:$0x1]  ;;  %s44_s17 = scalar_lea.vmem %s2970_s2, %s1942_s25  ;;  %s48_s20 = scalar_lea.vmem %s2970_s2, %s1943_s26 }
  0x17   :  { %v41_v1 = vld [vmem:[%s40_s14] sm:$0x1]  ;;  %38 = vst.msk [vmem:[#allocation2] sm:$0x1] %vm37_vm0, %v36_v0  ;;  %s52_s23 = scalar_lea.vmem %s2970_s2, %s1944_s27  ;;  %s56_s25 = scalar_lea.vmem %s2970_s2, %s1945_s28 }
  0x18   :  { %42 = vst.msk [vmem:[#allocation2 + $0x1] sm:$0x1] %vm37_vm0, %v41_v1  ;;  %v45_v2 = vld [vmem:[%s44_s17] sm:$0x1]  ;;  %s60_s11 = scalar_lea.vmem %s2970_s2, %s1946_s0  ;;  %s64_s27 = scalar_lea.vmem %s2970_s2, %s1947_s29  ;;  %2072 = vmatpush3.bf16.msra.mxu0 %v186_v42 }
  0x19   :  { %v49_v3 = vld [vmem:[%s48_s20] sm:$0x1]  ;;  %46 = vst.msk [vmem:[#allocation2 + $0x2] sm:$0x1] %vm37_vm0, %v45_v2  ;;  %s68_s15 = scalar_lea.vmem %s2970_s2, %s2389_s30  ;;  %s72_s18 = scalar_lea.vmem %s2970_s2, %s2391_s6  ;;  %2083 = vmatprep.subr.bf16.mxu0 %v2346_v39 }
  0x1a   :  { %50 = vst.msk [vmem:[#allocation2 + $0x3] sm:$0x1] %vm37_vm0, %v49_v3  ;;  %v53_v4 = vld [vmem:[%s52_s23] sm:$0x1]  ;;  %s76_s19 = scalar_lea.vmem %s2970_s2, %s2393_s7  ;;  %s80_s22 = scalar_lea.vmem %s2970_s2, %s2395_s8 }
  0x1b   :  { %v57_v5 = vld [vmem:[%s56_s25] sm:$0x1]  ;;  %54 = vst.msk [vmem:[#allocation2 + $0x4] sm:$0x1] %vm37_vm0, %v53_v4  ;;  %s1952_s30 = sld [smem:[#allocation3 + $0xc]]  ;;  %s1953_s6 = sld [smem:[#allocation3 + $0xd]] }
  0x1c   :  { %58 = vst.msk [vmem:[#allocation2 + $0x5] sm:$0x1] %vm37_vm0, %v57_v5  ;;  %v61_v6 = vld [vmem:[%s60_s11] sm:$0x1]  ;;  %s1954_s23 = sld [smem:[#allocation3 + $0xe]]  ;;  %s1955_s24 = sld [smem:[#allocation3 + $0xf]] }
  0x1d   :  { %v65_v7 = vld [vmem:[%s64_s27] sm:$0x1]  ;;  %62 = vst.msk [vmem:[#allocation2 + $0x6] sm:$0x1] %vm37_vm0, %v61_v6  ;;  %s2351_s28 = smov 80   ;;  %s2352_s14 = smov 112  }
  0x1e   :  { %66 = vst.msk [vmem:[#allocation2 + $0x7] sm:$0x1] %vm37_vm0, %v65_v7  ;;  %v69_v8 = vld [vmem:[%s68_s15] sm:$0x1]  ;;  %s2355_s17 = smov 120  }
  0x1f   :  { %v73_v9 = vld [vmem:[%s72_s18] sm:$0x1]  ;;  %70 = vst.msk [vmem:[#allocation2 + $0x8] sm:$0x1] %vm37_vm0, %v69_v8 }
  0x20   :  { %74 = vst.msk [vmem:[#allocation2 + $0x9] sm:$0x1] %vm37_vm0, %v73_v9  ;;  %v77_v10 = vld [vmem:[%s76_s19] sm:$0x1]  ;;  %v2349_v9 = vmov 1966171168  }
  0x21   :  { %v81_v11 = vld [vmem:[%s80_s22] sm:$0x1]  ;;  %78 = vst.msk [vmem:[#allocation2 + $0xa] sm:$0x1] %vm37_vm0, %v77_v10  ;;  %s84_s11 = scalar_lea.vmem %s2970_s2, %s1952_s30  ;;  %s88_s27 = scalar_lea.vmem %s2970_s2, %s1953_s6  ;;  %v158_v10 = vunpack.c.l.s4 %v2349_v9 }
  0x22   :  { %82 = vst.msk [vmem:[#allocation2 + $0xb] sm:$0x1] %vm37_vm0, %v81_v11  ;;  %v85_v16 = vld [vmem:[%s84_s11] sm:$0x1]  ;;  %s92_s15 = scalar_lea.vmem %s2970_s2, %s1954_s23  ;;  %s96_s18 = scalar_lea.vmem %s2970_s2, %s1955_s24  ;;  %v160_v11 = vlaneseq }
  0x23   :  { %86 = vst.msk [vmem:[#allocation2 + $0xc] sm:$0x1] %vm37_vm0, %v85_v16  ;;  %v89_v17 = vld [vmem:[%s88_s27] sm:$0x1]  ;;  %s2348_s11 = smov 96   ;;  %s2350_s27 = smov 64  }
  0x24   :  { %v93_v18 = vld [vmem:[%s92_s15] sm:$0x1]  ;;  %90 = vst.msk [vmem:[#allocation2 + $0xd] sm:$0x1] %vm37_vm0, %v89_v17  ;;  %s2353_s15 = smov 48   ;;  %s2354_s22 = smov 16  }
  0x25   :  { %v99_v13 = vld [vmem:[#allocation2] sm:$0xff]  ;;  %94 = vst.msk [vmem:[#allocation2 + $0xe] sm:$0x1] %vm37_vm0, %v93_v18 }
  0x26   :  { %v102_v15 = vadd.f32 %v101_v12, %v99_v13  ;;  %v97_v20 = vld [vmem:[%s96_s18] sm:$0x1] }
  0x27   :  { %98 = vst.msk [vmem:[#allocation2 + $0xf] sm:$0x1] %vm37_vm0, %v97_v20 }
  0x28   :  { %v109_v19 = vadd.f32 %v1956_v14, %v102_v15  ;;  %v161_v15 = vshrl.u32 %v160_v11, 7 }
  0x2a   :  { %v114_v21 = vsel %vm113_vm1, %v109_v19, 0.0 }
  0x2b   :  { %115 = vadd.xlane.f32.xlu0 %v114_v21  ;;  %v239_v21 = vsub.s32 0, %v161_v15 }
  0x2e   :  { %v100_v22 = vld [vmem:[#allocation2 + $0x8] sm:$0xff] }
  0x2f   :  { %v103_v23 = vadd.f32 %v101_v12, %v100_v22  ;;  %v153_v12 = vld [vmem:[%s2969_s1] sm:$0x3] }
  0x30   :  { %v154_v13 = vsub.f32 1.0, %v153_v12 }
  0x31   :  { %v110_v24 = vadd.f32 %v1956_v14, %v103_v23  ;;  %v159_v14 = vunpack.c.0.s8 %v158_v10 }
  0x32   :  { %v155_v16 = vmul.f32 -1e+09, %v154_v13 }
  0x33   :  { %v117_v25 = vsel %vm113_vm1, %v110_v24, 0.0  ;;  %v162_v17 = vsub.s32 %v159_v14, %v161_v15 }
  0x34   :  { %118 = vadd.xlane.f32.xlu0 %v117_v25 }
  0x35   :  { %v163_v18 = vrot.slane %v155_v16, %v162_v17 }
  0x37   :  { %v171_v20 = vrot.slane %v163_v18, %v162_v17 }
  0x39   :  { %v2540_v23 = vrot.slane %v171_v20, %v239_v21 }
  0xb8   :  { %v116_v26 = vpop.xlane.xlu0 %115 }
  0xb9   :  { %v121_v27 = vmul.f32 0.03125, %v116_v26 }
  0xbb   :  { %v123_v28 = vsub.f32 %v109_v19, %v121_v27  ;;  %v164_v19 = vcombine.high %v163_v18, %v163_v18 }
  0xbd   :  { %v125_v29 = vmul.f32 %v123_v28, %v123_v28  ;;  %v178_v22 = vrot.slane %v164_v19, %v162_v17 }
  0xbf   :  { %v127_v30 = vsel %vm113_vm1, %v125_v29, 0.0 }
  0xc0   :  { %128 = vadd.xlane.f32.xlu1 %v127_v30 }
  0xc1   :  { %v119_v31 = vpop.xlane.xlu0 %118 }
  0xc2   :  { %v122_v32 = vmul.f32 0.03125, %v119_v31 }
  0xc4   :  { %v124_v33 = vsub.f32 %v110_v24, %v122_v32  ;;  %v2542_v24 = vrot.slane %v178_v22, %v239_v21 }
  0xc6   :  { %v126_v34 = vmul.f32 %v124_v33, %v124_v33 }
  0xc8   :  { %v130_v35 = vsel %vm113_vm1, %v126_v34, 0.0 }
  0xc9   :  { %131 = vadd.xlane.f32.xlu1 %v130_v35 }
 0x14d   :  { %v129_v43 = vpop.xlane.xlu1 %128 }
 0x14e   :  { %v133_v44 = vmul.f32 0.03125, %v129_v43 }
 0x150   :  { %v135_v45 = vadd.f32 1e-12, %v133_v44 }
 0x152   :  { %2264 = vrsqrt.f32 %v135_v45 }
 0x156   :  { %v132_v46 = vpop.xlane.xlu1 %131 }
 0x157   :  { %v134_v47 = vmul.f32 0.03125, %v132_v46 }
 0x159   :  { %v136_v48 = vadd.f32 1e-12, %v134_v47 }
 0x15b   :  { %2266 = vrsqrt.f32 %v136_v48 }
 0x15c   :  { %v2265_v49 = vpop.eup %2264 }
 0x15d   :  { %v139_v50 = vmul.f32 %v2265_v49, %v123_v28 }
 0x15f   :  { %v145_v54 = vmul.f32 %v1957_v51, %v139_v50 }
 0x161   :  { %v2505_v57 = vadd.f32 %v1958_v55, %v145_v54 }
 0x165   :  { %v2267_v52 = vpop.eup %2266 }
 0x166   :  { %v140_v53 = vmul.f32 %v2267_v52, %v124_v33 }
 0x168   :  { %v146_v56 = vmul.f32 %v1957_v51, %v140_v53 }
 0x16a   :  { %v2507_v58 = vadd.f32 %v1958_v55, %v146_v56 }
 0x16c   :  { %v184_v59 = vpack.c.bf16 %v2507_v58, %v2505_v57 }
 0x16e   :  { %2074 = vmatmul.mubr.msk.bf16.vlgmr.msra.gmra.mrb[0].mxu0 %vm113_vm1, %v184_v59 }
 0x16f   :  { %2085 = vmatprep.mubr.msk.bf16.mxu0 %vm2347_vm2, %v2346_v39 }
 0x241   :  { %v228_v61 = vpop.f32.mrb[0].mxu0 }
 0x242   :  { %v229_v62 = vadd.f32 %v1959_v60, %v228_v61  ;;  %v2075_v63 = vpop.f32.mrb[1].mxu0 }
 0x243   :  { %v231_v0 = vpop.f32.mrb[2].mxu0 }
 0x244   :  { %v2517_v1 = vpack.c.bf16 %v229_v62, %v229_v62  ;;  %v232_v2 = vadd.f32 %v1959_v60, %v231_v0  ;;  %v2076_v3 = vpop.f32.mrb[3].mxu0 }
 0x246   :  { %v2519_v4 = vpack.c.bf16 %v232_v2, %v232_v2  ;;  %248 = vrot.lane.b32.xlu0 %v2517_v1, %s2348_s11 }
 0x248   :  { %298 = vrot.lane.b32.xlu1 %v2519_v4, %s2348_s11 }
 0x2b8   :  { %v249_v5 = vpop.permute.xlu0 %248 }
 0x2b9   :  { %v255_v6 = vsel %vm250_vm3, %v249_v5, 0 }
 0x2ba   :  { %2078 = vmatpush3.bf16.xpose.msra.mxu1 %v255_v6  ;;  %v299_v7 = vpop.permute.xlu1 %298 }
 0x2bb   :  { %v304_v8 = vsel %vm250_vm3, %v299_v7, 0  ;;  %2089 = vmatprep.subr.bf16.mxu1 %v2346_v39 }
 0x2bc   :  { %2084 = vmatpush3.bf16.xpose.msra.mxu0 %v304_v8 }
 0x2bd   :  { %2095 = vmatprep.subr.bf16.mxu0 %v2346_v39 }
 0x2c1   :  { %2080 = vmatmul.mubr.msk.bf16.vlgmr.msra.gmra.mrb[0].mxu1 %vm250_vm3, %v2517_v1 }
 0x2c2   :  { %2091 = vmatprep.mubr.msk.bf16.mxu1 %vm2347_vm2, %v2346_v39 }
 0x2c3   :  { %2086 = vmatmul.mubr.msk.bf16.vlgmr.msra.gmra.mrb[4].mxu0 %vm250_vm3, %v2519_v4 }
 0x2c4   :  { %2097 = vmatprep.mubr.msk.bf16.mxu0 %vm2347_vm2, %v2346_v39 }
 0x394   :  { %v291_v25 = vpop.f32.mrb[0].mxu1 }
 0x395   :  { %v292_v26 = vadd.f32 %v291_v25, %v2540_v23  ;;  %v2081_v27 = vpop.f32.mrb[1].mxu1 }
 0x396   :  { %v294_v28 = vpop.f32.mrb[2].mxu1  ;;  %v340_v29 = vpop.f32.mrb[4].mxu0 }
 0x397   :  { %v341_v30 = vadd.f32 %v340_v29, %v2542_v24  ;;  %v2082_v31 = vpop.f32.mrb[3].mxu1  ;;  %v2087_v32 = vpop.f32.mrb[5].mxu0  ;;  %v347_v33 = vsel %vm346_vm4, %v292_v26, -inf }
 0x398   :  { %348 = vmax.xlane.f32.xlu1 %v347_v33  ;;  %v343_v34 = vpop.f32.mrb[6].mxu0 }
 0x399   :  { %v2088_v35 = vpop.f32.mrb[7].mxu0  ;;  %v350_v36 = vsel %vm346_vm4, %v341_v30, -inf }
 0x39a   :  { %351 = vmax.xlane.f32.xlu0 %v350_v36 }
 0x3a9   :  { %420 = vrot.lane.b32.xlu1 %v2519_v4, %s2350_s27 }
 0x3ad   :  { %472 = vrot.lane.b32.xlu1 %v2517_v1, %s2351_s28 }
 0x425   :  { %v349_v37 = vpop.xlane.xlu1 %348 }
 0x426   :  { %v353_v38 = vsub.f32 %v292_v26, %v349_v37 }
 0x427   :  { %v352_v40 = vpop.xlane.xlu0 %351 }
 0x428   :  { %v355_v41 = vmul.f32 1.442695, %v353_v38  ;;  %v354_v42 = vsub.f32 %v341_v30, %v352_v40 }
 0x429   :  { %v421_v43 = vpop.permute.xlu1 %420 }
 0x42a   :  { %2268 = vpow2.f32 %v355_v41  ;;  %v357_v44 = vmul.f32 1.442695, %v354_v42  ;;  %v426_v45 = vsel %vm376_vm5, %v421_v43, 0 }
 0x42b   :  { %2096 = vmatpush3.bf16.msra.mxu0 %v426_v45 }
 0x42c   :  { %2270 = vpow2.f32 %v357_v44  ;;  %2107 = vmatprep.subr.bf16.mxu0 %v2346_v39 }
 0x42d   :  { %v473_v50 = vpop.permute.xlu1 %472 }
 0x42e   :  { %v478_v63 = vsel %vm250_vm3, %v473_v50, 0  ;;  %v704_v50 = vld [vmem:[%s2970_s2 + $0xc8] sm:$0xff] }
 0x434   :  { %v2269_v46 = vpop.eup %2268 }
 0x435   :  { %v359_v47 = vsel %vm346_vm4, %v2269_v46, 0.0 }
 0x436   :  { %v2271_v48 = vpop.eup %2270  ;;  %360 = vadd.xlane.f32.xlu0 %v359_v47 }
 0x437   :  { %v362_v49 = vsel %vm346_vm4, %v2271_v48, 0.0 }
 0x438   :  { %363 = vadd.xlane.f32.xlu1 %v362_v49  ;;  %v703_v49 = vld [vmem:[%s2970_s2 + $0xc0] sm:$0xff] }
 0x449   :  { %522 = vrot.lane.b32.xlu1 %v2519_v4, %s2351_s28 }
 0x44c   :  { %371 = vrot.lane.b32.xlu0 %v2517_v1, %s2350_s27 }
 0x44d   :  { %520 = vrot.lane.b32.xlu1 %v2519_v4, %s2352_s14 }
 0x450   :  { %470 = vrot.lane.b32.xlu0 %v2517_v1, %s2352_s14 }
 0x4c3   :  { %v361_v51 = vpop.xlane.xlu0 %360 }
 0x4c4   :  { %2272 = vrcp.f32 %v361_v51  ;;  %v705_v51 = vld [vmem:[%s2970_s2 + $0xd0] sm:$0xff] }
 0x4c5   :  { %v364_v52 = vpop.xlane.xlu1 %363 }
 0x4c6   :  { %2274 = vrcp.f32 %v364_v52  ;;  %v708_v52 = vpack.c.bf16 %v704_v50, %v703_v49 }
 0x4c7   :  { %v372_v53 = vpop.permute.xlu0 %371 }
 0x4c8   :  { %v378_v54 = vsel %vm376_vm5, %v372_v53, 0  ;;  %v706_v53 = vld [vmem:[%s2970_s2 + $0xd8] sm:$0xff] }
 0x4c9   :  { %2090 = vmatpush3.bf16.msra.mxu1 %v378_v54  ;;  %v523_v62 = vpop.permute.xlu1 %522  ;;  %v709_v54 = vpack.c.bf16 %v706_v53, %v705_v51  ;;  %v875_v51 = vld [vmem:[%s2970_s2 + $0xf8] sm:$0xff]  ;;  %v877_v53 = vld [vmem:[%s2970_s2 + $0x108] sm:$0xff] }
 0x4ca   :  { %2101 = vmatprep.subr.bf16.mxu1 %v2346_v39  ;;  %v528_v2 = vsel %vm250_vm3, %v523_v62, 0 }
 0x4cb   :  { %v471_v3 = vpop.permute.xlu0 %470 }
 0x4cd   :  { %v521_v5 = vpop.permute.xlu1 %520 }
 0x4ce   :  { %v2273_v55 = vpop.eup %2272 }
 0x4cf   :  { %v367_v56 = vmul.f32 %v2273_v55, %v2269_v46 }
 0x4d0   :  { %v2275_v59 = vpop.eup %2274 }
 0x4d1   :  { %v368_v60 = vmul.f32 %v2275_v59, %v2271_v48  ;;  %v369_v61 = vpack.c.bf16 %v367_v56, %v367_v56 }
 0x4d3   :  { %2092 = vmatmul.mubr.msk.bf16.vlgmr.msra.gmra.mrb[4].mxu1 %vm346_vm4, %v369_v61  ;;  %v370_v0 = vpack.c.bf16 %v368_v60, %v368_v60 }
 0x4d4   :  { %2102 = vmatpush3.bf16.xpose.msra.mxu1 %v478_v63  ;;  %2103 = vmatprep.mubr.msk.bf16.mxu1 %vm2347_vm2, %v2346_v39 }
 0x4d5   :  { %2098 = vmatmul.mubr.msk.bf16.vlgmr.msra.gmra.mrb[8].mxu0 %vm346_vm4, %v370_v0  ;;  %2113 = vmatprep.subr.bf16.mxu1 %v2346_v39 }
 0x4d6   :  { %2108 = vmatpush3.bf16.xpose.msra.mxu0 %v528_v2  ;;  %2109 = vmatprep.mubr.msk.bf16.mxu0 %vm2347_vm2, %v2346_v39 }
 0x4d7   :  { %2119 = vmatprep.subr.bf16.mxu0 %v2346_v39 }
 0x4db   :  { %2104 = vmatmul.mubr.msk.bf16.vlgmr.msra.gmra.mrb[8].mxu1 %vm250_vm3, %v471_v3 }
 0x4dc   :  { %2115 = vmatprep.mubr.msk.bf16.mxu1 %vm2347_vm2, %v2346_v39 }
 0x4dd   :  { %2110 = vmatmul.mubr.msk.bf16.vlgmr.msra.gmra.mrb[12].mxu0 %vm250_vm3, %v521_v5 }
 0x4de   :  { %2121 = vmatprep.mubr.msk.bf16.mxu0 %vm2347_vm2, %v2346_v39 }
 0x5a6   :  { %v414_v6 = vpop.f32.mrb[4].mxu1 }
 0x5a7   :  { %468 = vst.msk [vmem:[#allocation2] sm:$0xff] %vm250_vm3, %v414_v6  ;;  %v2093_v7 = vpop.f32.mrb[5].mxu1 }
 0x5a8   :  { %v417_v8 = vpop.f32.mrb[6].mxu1  ;;  %v462_v9 = vpop.f32.mrb[8].mxu0 }
 0x5a9   :  { %469 = vst.msk [vmem:[#allocation2 + $0x8] sm:$0xff] %vm250_vm3, %v462_v9  ;;  %v2094_v10 = vpop.f32.mrb[7].mxu1  ;;  %v2099_v11 = vpop.f32.mrb[9].mxu0  ;;  %v1969_v8 = vld [vmem:[%s2970_s2 + $0xe0] ss:$0 sm:$0xff] }
 0x5aa   :  { %v465_v12 = vpop.f32.mrb[10].mxu0 }
 0x5ab   :  { %v2100_v13 = vpop.f32.mrb[11].mxu0 }
 0x5ae   :  { %v514_v14 = vpop.f32.mrb[8].mxu1 }
 0x5af   :  { %v515_v15 = vadd.f32 %v514_v14, %v2540_v23  ;;  %v2105_v16 = vpop.f32.mrb[9].mxu1 }
 0x5b0   :  { %v517_v17 = vpop.f32.mrb[10].mxu1  ;;  %v564_v18 = vpop.f32.mrb[12].mxu0 }
 0x5b1   :  { %v565_v19 = vadd.f32 %v564_v18, %v2542_v24  ;;  %v2106_v20 = vpop.f32.mrb[11].mxu1  ;;  %v2111_v21 = vpop.f32.mrb[13].mxu0  ;;  %v570_v22 = vsel %vm346_vm4, %v515_v15, -inf }
 0x5b2   :  { %571 = vmax.xlane.f32.xlu0 %v570_v22  ;;  %v567_v25 = vpop.f32.mrb[14].mxu0 }
 0x5b3   :  { %v2112_v26 = vpop.f32.mrb[15].mxu0  ;;  %v573_v27 = vsel %vm346_vm4, %v565_v19, -inf }
 0x5b4   :  { %574 = vmax.xlane.f32.xlu1 %v573_v27 }
 0x5c5   :  { %642 = vrot.lane.b32.xlu1 %v2519_v4, %s2353_s15 }
 0x63f   :  { %v572_v28 = vpop.xlane.xlu0 %571 }
 0x640   :  { %v576_v29 = vsub.f32 %v515_v15, %v572_v28 }
 0x641   :  { %v575_v30 = vpop.xlane.xlu1 %574 }
 0x642   :  { %v578_v31 = vmul.f32 1.442695, %v576_v29  ;;  %v577_v32 = vsub.f32 %v565_v19, %v575_v30  ;;  %v802_v30 = vld [vmem:[%s2972_s4 + $0x8] sm:$0xff] }
 0x644   :  { %2276 = vpow2.f32 %v578_v31  ;;  %v580_v33 = vmul.f32 1.442695, %v577_v32  ;;  %v803_v32 = vld [vmem:[%s2972_s4 + $0x10] sm:$0xff] }
 0x645   :  { %v643_v34 = vpop.permute.xlu1 %642 }
 0x646   :  { %2278 = vpow2.f32 %v580_v33  ;;  %v648_v35 = vsel %vm376_vm5, %v643_v34, 0  ;;  %v804_v33 = vld [vmem:[%s2972_s4 + $0x18] sm:$0xff] }
 0x647   :  { %2120 = vmatpush3.bf16.msra.mxu0 %v648_v35  ;;  %v808_v34 = vpack.c.bf16 %v804_v33, %v803_v32 }
 0x648   :  { %2133 = vmatprep.subr.bf16.mxu0 %v2346_v39 }
 0x64e   :  { %v2277_v36 = vpop.eup %2276 }
 0x64f   :  { %v582_v37 = vsel %vm346_vm4, %v2277_v36, 0.0 }
 0x650   :  { %v2279_v38 = vpop.eup %2278  ;;  %583 = vadd.xlane.f32.xlu0 %v582_v37 }
 0x651   :  { %v585_v4 = vsel %vm346_vm4, %v2279_v38, 0.0 }
 0x654   :  { %586 = vadd.xlane.f32.xlu0 %v585_v4 }
 0x66a   :  { %594 = vrot.lane.b32.xlu0 %v2517_v1, %s2353_s15 }
 0x6dd   :  { %v584_v40 = vpop.xlane.xlu0 %583 }
 0x6de   :  { %2280 = vrcp.f32 %v584_v40 }
 0x6e1   :  { %v587_v41 = vpop.xlane.xlu0 %586 }
 0x6e2   :  { %2282 = vrcp.f32 %v587_v41 }
 0x6e5   :  { %v595_v42 = vpop.permute.xlu0 %594 }
 0x6e6   :  { %v600_v43 = vsel %vm376_vm5, %v595_v42, 0 }
 0x6e7   :  { %2114 = vmatpush3.bf16.msra.mxu1 %v600_v43  ;;  %v1971_v43 = vld [vmem:[%s2970_s2 + $0xe8] ss:$0 sm:$0xff] }
 0x6e8   :  { %v2281_v44 = vpop.eup %2280  ;;  %2125 = vmatprep.subr.bf16.mxu1 %v2346_v39 }
 0x6e9   :  { %v590_v45 = vmul.f32 %v2281_v44, %v2277_v36 }
 0x6eb   :  { %v592_v46 = vpack.c.bf16 %v590_v45, %v590_v45 }
 0x6ec   :  { %v2283_v47 = vpop.eup %2282 }
 0x6ed   :  { %v591_v48 = vmul.f32 %v2283_v47, %v2279_v38  ;;  %2116 = vmatmul.mubr.msk.bf16.vlgmr.msra.gmra.mrb[12].mxu1 %vm346_vm4, %v592_v46  ;;  %v1972_v47 = vld [vmem:[%s2970_s2 + $0xf0] ss:$0 sm:$0xff] }
 0x6ee   :  { %2129 = vmatprep.mubr.msk.bf16.mxu1 %vm2347_vm2, %v2346_v39  ;;  %2126 = vmatpush3.bf16.msra.mxu1 %v708_v52  ;;  %v876_v52 = vld [vmem:[%s2970_s2 + $0x100] sm:$0xff] }
 0x6ef   :  { %v593_v1 = vpack.c.bf16 %v591_v48, %v591_v48  ;;  %2127 = vmatprep.subr.bf16.mxu1 %v2346_v39 }
 0x6f1   :  { %2122 = vmatmul.mubr.msk.bf16.vlgmr.msra.gmra.mrb[16].mxu0 %vm346_vm4, %v593_v1 }
 0x6f2   :  { %2137 = vmatprep.mubr.msk.bf16.mxu0 %vm2347_vm2, %v2346_v39  ;;  %2128 = vmatpush3.bf16.msra.mxu1 %v709_v54  ;;  %v884_v54 = vpack.c.bf16 %v876_v52, %v875_v51  ;;  %v982_v52 = vld [vmem:[%s2971_s3 + $0x38] sm:$0xff] }
 0x6f3   :  { %2141 = vmatprep.subr.bf16.mxu1 %v2346_v39 }
 0x7c0   :  { %v636_v55 = vpop.f32.mrb[12].mxu1 }
 0x7c1   :  { %692 = vrot.lane.b32.xlu1 %v636_v55, %s2354_s22  ;;  %v2117_v56 = vpop.f32.mrb[13].mxu1  ;;  %v878_v55 = vld [vmem:[%s2970_s2 + $0x110] sm:$0xff] }
 0x7c2   :  { %v639_v59 = vpop.f32.mrb[14].mxu1  ;;  %v885_v56 = vpack.c.bf16 %v878_v55, %v877_v53  ;;  %v983_v53 = vld [vmem:[%s2971_s3 + $0x40] sm:$0xff] }
 0x7c3   :  { %v2118_v60 = vpop.f32.mrb[15].mxu1  ;;  %v879_v59 = vld [vmem:[%s2970_s2 + $0x118] sm:$0xff] }
 0x7c4   :  { %v684_v61 = vpop.f32.mrb[16].mxu0  ;;  %v880_v60 = vld [vmem:[%s2970_s2 + $0x120] sm:$0xff] }
 0x7c5   :  { %694 = vrot.lane.b32.xlu1 %v684_v61, %s2354_s22  ;;  %v2123_v62 = vpop.f32.mrb[17].mxu0  ;;  %v886_v61 = vpack.c.bf16 %v880_v60, %v879_v59 }
 0x7c6   :  { %v687_v63 = vpop.f32.mrb[18].mxu0  ;;  %v881_v62 = vld [vmem:[%s2970_s2 + $0x128] sm:$0xff] }
 0x7c7   :  { %v2124_v0 = vpop.f32.mrb[19].mxu0  ;;  %v882_v63 = vld [vmem:[%s2970_s2 + $0x130] sm:$0xff] }
 0x7c8   :  { %v887_v0 = vpack.c.bf16 %v882_v63, %v881_v62 }
 0x833   :  { %v693_v2 = vpop.permute.xlu1 %692 }
 0x834   :  { %699 = vst.msk [vmem:[#allocation2] sm:$0xff] %vm698_vm6, %v693_v2  ;;  %v1973_v2 = vld [vmem:[%s2972_s4 + $0x20] ss:$0 sm:$0xff] }
 0x837   :  { %v695_v3 = vpop.permute.xlu1 %694 }
 0x838   :  { %700 = vst.msk [vmem:[#allocation2 + $0x8] sm:$0xff] %vm698_vm6, %v695_v3 }
 0x83b   :  { %v701_v5 = vld [vmem:[#allocation2] sm:$0xff] }
 0x83f   :  { %v702_v6 = vld [vmem:[#allocation2 + $0x8] sm:$0xff] }
 0x840   :  { %v707_v7 = vpack.c.bf16 %v702_v6, %v701_v5 }
 0x842   :  { %2130 = vmatmul.mubr.msk.bf16.vlgmr.msra.gmra.mrb[16].mxu1 %vm113_vm1, %v707_v7 }
 0x843   :  { %2149 = vmatprep.mubr.msk.bf16.mxu1 %vm2347_vm2, %v2346_v39  ;;  %2142 = vmatpush3.bf16.msra.mxu1 %v884_v54  ;;  %v987_v54 = vpack.c.bf16 %v983_v53, %v982_v52 }
 0x844   :  { %2143 = vmatprep.subr.bf16.mxu1 %v2346_v39 }
 0x847   :  { %2144 = vmatpush3.bf16.msra.mxu1 %v885_v56 }
 0x848   :  { %2145 = vmatprep.subr.bf16.mxu1 %v2346_v39 }
 0x84b   :  { %2146 = vmatpush3.bf16.msra.mxu1 %v886_v61 }
 0x84c   :  { %2147 = vmatprep.subr.bf16.mxu1 %v2346_v39 }
 0x84f   :  { %2148 = vmatpush3.bf16.msra.mxu1 %v887_v0  ;;  %v1977_v0 = vld [vmem:[%s2970_s2 + $0x140] ss:$0 sm:$0xff] }
 0x850   :  { %2167 = vmatprep.subr.bf16.mxu1 %v2346_v39 }
 0x915   :  { %v752_v9 = vpop.f32.mrb[16].mxu1 }
 0x916   :  { %v753_v10 = vadd.f32 %v1969_v8, %v752_v9  ;;  %v2131_v11 = vpop.f32.mrb[17].mxu1 }
 0x917   :  { %v755_v12 = vpop.f32.mrb[18].mxu1 }
 0x918   :  { %v756_v13 = vadd.f32 %v1969_v8, %v755_v12  ;;  %v2132_v14 = vpop.f32.mrb[19].mxu1  ;;  %v759_v15 = vadd.f32 %v753_v10, %v2505_v57 }
 0x91a   :  { %v763_v16 = vsel %vm113_vm1, %v759_v15, 0.0  ;;  %v760_v17 = vadd.f32 %v756_v13, %v2507_v58  ;;  %v801_v58 = vld [vmem:[%s2972_s4] sm:$0xff] }
 0x91b   :  { %764 = vadd.xlane.f32.xlu0 %v763_v16  ;;  %v807_v31 = vpack.c.bf16 %v802_v30, %v801_v58  ;;  %v1975_v58 = vld [vmem:[%s2970_s2 + $0x138] ss:$0 sm:$0xff] }
 0x91c   :  { %v766_v18 = vsel %vm113_vm1, %v760_v17, 0.0 }
 0x91d   :  { %767 = vadd.xlane.f32.xlu1 %v766_v18  ;;  %2134 = vmatpush3.bf16.msra.mxu0 %v807_v31 }
 0x91e   :  { %2135 = vmatprep.subr.bf16.mxu0 %v2346_v39 }
 0x921   :  { %2136 = vmatpush3.bf16.msra.mxu0 %v808_v34 }
 0x922   :  { %2153 = vmatprep.subr.bf16.mxu0 %v2346_v39 }
 0x9a8   :  { %v765_v19 = vpop.xlane.xlu0 %764 }
 0x9a9   :  { %v769_v20 = vmul.f32 0.03125, %v765_v19 }
 0x9aa   :  { %v768_v21 = vpop.xlane.xlu1 %767 }
 0x9ab   :  { %v771_v22 = vsub.f32 %v759_v15, %v769_v20  ;;  %v770_v25 = vmul.f32 0.03125, %v768_v21 }
 0x9ad   :  { %v772_v26 = vsub.f32 %v760_v17, %v770_v25  ;;  %v773_v27 = vmul.f32 %v771_v22, %v771_v22 }
 0x9af   :  { %v775_v28 = vsel %vm113_vm1, %v773_v27, 0.0  ;;  %v774_v29 = vmul.f32 %v772_v26, %v772_v26 }
 0x9b0   :  { %776 = vadd.xlane.f32.xlu0 %v775_v28 }
 0x9b1   :  { %v778_v57 = vsel %vm113_vm1, %v774_v29, 0.0 }
 0x9b4   :  { %779 = vadd.xlane.f32.xlu0 %v778_v57 }
 0xa3d   :  { %v777_v35 = vpop.xlane.xlu0 %776 }
 0xa3e   :  { %v781_v36 = vmul.f32 0.03125, %v777_v35 }
 0xa40   :  { %v783_v37 = vadd.f32 1e-12, %v781_v36 }
 0xa41   :  { %v780_v38 = vpop.xlane.xlu0 %779 }
 0xa42   :  { %2284 = vrsqrt.f32 %v783_v37  ;;  %v782_v4 = vmul.f32 0.03125, %v780_v38 }
 0xa44   :  { %v784_v40 = vadd.f32 1e-12, %v782_v4 }
 0xa46   :  { %2286 = vrsqrt.f32 %v784_v40 }
 0xa4c   :  { %v2285_v41 = vpop.eup %2284 }
 0xa4d   :  { %v787_v42 = vmul.f32 %v2285_v41, %v771_v22 }
 0xa4f   :  { %v793_v45 = vmul.f32 %v1971_v43, %v787_v42 }
 0xa50   :  { %v2287_v44 = vpop.eup %2286 }
 0xa51   :  { %v788_v46 = vmul.f32 %v2287_v44, %v772_v26  ;;  %v2654_v1 = vadd.f32 %v1972_v47, %v793_v45 }
 0xa53   :  { %v794_v48 = vmul.f32 %v1971_v43, %v788_v46 }
 0xa55   :  { %v2656_v49 = vadd.f32 %v1972_v47, %v794_v48 }
 0xa57   :  { %v806_v50 = vpack.c.bf16 %v2656_v49, %v2654_v1 }
 0xa59   :  { %2138 = vmatmul.mubr.msk.bf16.vlgmr.msra.gmra.mrb[20].mxu0 %vm113_vm1, %v806_v50  ;;  %v981_v50 = vld [vmem:[%s2971_s3 + $0x30] sm:$0xff] }
 0xa5a   :  { %2157 = vmatprep.mubr.msk.bf16.mxu0 %vm2347_vm2, %v2346_v39 }
 0xb2c   :  { %v850_v3 = vpop.f32.mrb[20].mxu0 }
 0xb2d   :  { %v851_v5 = vadd.f32 %v1973_v2, %v850_v3  ;;  %v2139_v6 = vpop.f32.mrb[21].mxu0 }
 0xb2e   :  { %v853_v7 = vpop.f32.mrb[22].mxu0 }
 0xb2f   :  { %v859_v8 = vmul.f32 0.044715, %v851_v5  ;;  %v854_v9 = vadd.f32 %v1973_v2, %v853_v7  ;;  %v2140_v10 = vpop.f32.mrb[23].mxu0  ;;  %v857_v25 = vmul.f32 0.5, %v851_v5  ;;  %v1978_v7 = vld [vmem:[%s2970_s2 + $0x148] ss:$0 sm:$0xff] }
 0xb31   :  { %v861_v11 = vmul.f32 %v859_v8, %v851_v5  ;;  %v860_v12 = vmul.f32 0.044715, %v854_v9  ;;  %v858_v26 = vmul.f32 0.5, %v854_v9 }
 0xb33   :  { %v863_v13 = vmul.f32 %v861_v11, %v851_v5  ;;  %v862_v14 = vmul.f32 %v860_v12, %v854_v9  ;;  %v1979_v12 = vld [vmem:[%s2971_s3 + $0x48] ss:$0 sm:$0xff] }
 0xb35   :  { %v865_v15 = vadd.f32 %v863_v13, %v851_v5  ;;  %v864_v16 = vmul.f32 %v862_v14, %v854_v9 }
 0xb37   :  { %v867_v17 = vmul.f32 0.7978846, %v865_v15  ;;  %v866_v18 = vadd.f32 %v864_v16, %v854_v9 }
 0xb39   :  { %2288 = vtanh.f32 %v867_v17  ;;  %v868_v19 = vmul.f32 0.7978846, %v866_v18 }
 0xb3b   :  { %2290 = vtanh.f32 %v868_v19 }
 0xb43   :  { %v2289_v20 = vpop.eup %2288 }
 0xb44   :  { %v871_v21 = vadd.f32 1.0, %v2289_v20 }
 0xb45   :  { %v2291_v22 = vpop.eup %2290 }
 0xb46   :  { %v872_v27 = vadd.f32 1.0, %v2291_v22  ;;  %v873_v28 = vmul.f32 %v871_v21, %v857_v25 }
 0xb48   :  { %v874_v29 = vmul.f32 %v872_v27, %v858_v26 }
 0xb4a   :  { %v883_v57 = vpack.c.bf16 %v874_v29, %v873_v28 }
 0xb4c   :  { %2150 = vmatmul.mubr.msk.bf16.vlgmr.msra.gmra.mrb[20].mxu1 %vm893_vm7, %v883_v57 }
 0xb4d   :  { %2169 = vmatprep.mubr.msk.bf16.mxu1 %vm2347_vm2, %v2346_v39 }
 0xc1f   :  { %v931_v30 = vpop.f32.mrb[20].mxu1 }
 0xc20   :  { %v932_v31 = vadd.f32 %v1975_v58, %v931_v30  ;;  %v2151_v32 = vpop.f32.mrb[21].mxu1 }
 0xc21   :  { %v934_v33 = vpop.f32.mrb[22].mxu1 }
 0xc22   :  { %v935_v34 = vadd.f32 %v1975_v58, %v934_v33  ;;  %v2152_v35 = vpop.f32.mrb[23].mxu1  ;;  %v938_v36 = vadd.f32 %v932_v31, %v2654_v1 }
 0xc24   :  { %v942_v37 = vsel %vm113_vm1, %v938_v36, 0.0  ;;  %v939_v38 = vadd.f32 %v935_v34, %v2656_v49  ;;  %v980_v49 = vld [vmem:[%s2971_s3 + $0x28] sm:$0xff] }
 0xc25   :  { %943 = vadd.xlane.f32.xlu0 %v942_v37  ;;  %v986_v51 = vpack.c.bf16 %v981_v50, %v980_v49 }
 0xc26   :  { %v945_v4 = vsel %vm113_vm1, %v939_v38, 0.0 }
 0xc27   :  { %946 = vadd.xlane.f32.xlu1 %v945_v4  ;;  %2154 = vmatpush3.bf16.msra.mxu0 %v986_v51 }
 0xc28   :  { %2155 = vmatprep.subr.bf16.mxu0 %v2346_v39 }
 0xc2b   :  { %2156 = vmatpush3.bf16.msra.mxu0 %v987_v54 }
 0xc2c   :  { %2161 = vmatprep.subr.bf16.mxu0 %v2346_v39 }
 0xcb2   :  { %v944_v40 = vpop.xlane.xlu0 %943 }
 0xcb3   :  { %v948_v41 = vmul.f32 0.03125, %v944_v40 }
 0xcb4   :  { %v947_v42 = vpop.xlane.xlu1 %946 }
 0xcb5   :  { %v950_v43 = vsub.f32 %v938_v36, %v948_v41  ;;  %v949_v44 = vmul.f32 0.03125, %v947_v42 }
 0xcb7   :  { %v951_v45 = vsub.f32 %v939_v38, %v949_v44  ;;  %v952_v46 = vmul.f32 %v950_v43, %v950_v43 }
 0xcb9   :  { %v954_v47 = vsel %vm113_vm1, %v952_v46, 0.0  ;;  %v953_v48 = vmul.f32 %v951_v45, %v951_v45 }
 0xcba   :  { %955 = vadd.xlane.f32.xlu0 %v954_v47 }
 0xcbb   :  { %v957_v1 = vsel %vm113_vm1, %v953_v48, 0.0 }
 0xcbc   :  { %958 = vadd.xlane.f32.xlu1 %v957_v1 }
 0xd47   :  { %v956_v55 = vpop.xlane.xlu0 %955 }
 0xd48   :  { %v960_v56 = vmul.f32 0.03125, %v956_v55 }
 0xd49   :  { %v959_v59 = vpop.xlane.xlu1 %958 }
 0xd4a   :  { %v962_v60 = vadd.f32 1e-12, %v960_v56  ;;  %v961_v61 = vmul.f32 0.03125, %v959_v59 }
 0xd4c   :  { %2292 = vrsqrt.f32 %v962_v60  ;;  %v963_v62 = vadd.f32 1e-12, %v961_v61 }
 0xd4e   :  { %2294 = vrsqrt.f32 %v963_v62 }
 0xd56   :  { %v2293_v63 = vpop.eup %2292 }
 0xd57   :  { %v966_v2 = vmul.f32 %v2293_v63, %v950_v43 }
 0xd58   :  { %v2295_v3 = vpop.eup %2294 }
 0xd59   :  { %v972_v5 = vmul.f32 %v1977_v0, %v966_v2  ;;  %v967_v6 = vmul.f32 %v2295_v3, %v951_v45 }
 0xd5b   :  { %v973_v8 = vmul.f32 %v1977_v0, %v967_v6  ;;  %v2726_v9 = vadd.f32 %v1978_v7, %v972_v5 }
 0xd5d   :  { %v2728_v10 = vadd.f32 %v1978_v7, %v973_v8 }
 0xd5f   :  { %v985_v11 = vpack.c.bf16 %v2728_v10, %v2726_v9 }
 0xd61   :  { %2158 = vmatmul.mubr.msk.bf16.vlgmr.msra.gmra.mrb[24].mxu0 %vm113_vm1, %v985_v11 }
 0xd62   :  { %2163 = vmatprep.mubr.msk.bf16.mxu0 %vm2347_vm2, %v2346_v39 }
 0xe34   :  { %v1029_v13 = vpop.f32.mrb[24].mxu0 }
 0xe35   :  { %v1030_v14 = vadd.f32 %v1979_v12, %v1029_v13  ;;  %v2159_v15 = vpop.f32.mrb[25].mxu0 }
 0xe36   :  { %v1032_v16 = vpop.f32.mrb[26].mxu0 }
 0xe37   :  { %v2738_v17 = vpack.c.bf16 %v1030_v14, %v1030_v14  ;;  %v1033_v18 = vadd.f32 %v1979_v12, %v1032_v16  ;;  %v2160_v19 = vpop.f32.mrb[27].mxu0 }
 0xe39   :  { %v2740_v20 = vpack.c.bf16 %v1033_v18, %v1033_v18  ;;  %1039 = vrot.lane.b32.xlu0 %v2738_v17, %s2348_s11 }
 0xe3b   :  { %1088 = vrot.lane.b32.xlu1 %v2740_v20, %s2348_s11 }
 0xeab   :  { %v1040_v21 = vpop.permute.xlu0 %1039 }
 0xeac   :  { %v1045_v22 = vsel %vm250_vm3, %v1040_v21, 0 }
 0xead   :  { %2162 = vmatpush3.bf16.xpose.msra.mxu0 %v1045_v22  ;;  %v1089_v25 = vpop.permute.xlu1 %1088 }
 0xeae   :  { %v1094_v26 = vsel %vm250_vm3, %v1089_v25, 0  ;;  %2173 = vmatprep.subr.bf16.mxu0 %v2346_v39 }
 0xeaf   :  { %2168 = vmatpush3.bf16.xpose.msra.mxu1 %v1094_v26 }
 0xeb0   :  { %2179 = vmatprep.subr.bf16.mxu1 %v2346_v39 }
 0xeb4   :  { %2164 = vmatmul.mubr.msk.bf16.vlgmr.msra.gmra.mrb[28].mxu0 %vm250_vm3, %v2738_v17 }
 0xeb5   :  { %2175 = vmatprep.mubr.msk.bf16.mxu0 %vm2347_vm2, %v2346_v39 }
 0xeb6   :  { %2170 = vmatmul.mubr.msk.bf16.vlgmr.msra.gmra.mrb[24].mxu1 %vm250_vm3, %v2740_v20 }
 0xeb7   :  { %2181 = vmatprep.mubr.msk.bf16.mxu1 %vm2347_vm2, %v2346_v39 }
 0xf87   :  { %v1081_v27 = vpop.f32.mrb[28].mxu0 }
 0xf88   :  { %v1082_v28 = vadd.f32 %v1081_v27, %v2540_v23  ;;  %v2165_v29 = vpop.f32.mrb[29].mxu0 }
 0xf89   :  { %v1084_v57 = vpop.f32.mrb[30].mxu0  ;;  %v1130_v58 = vpop.f32.mrb[24].mxu1 }
 0xf8a   :  { %v1131_v30 = vadd.f32 %v1130_v58, %v2542_v24  ;;  %v2166_v31 = vpop.f32.mrb[31].mxu0  ;;  %v2171_v32 = vpop.f32.mrb[25].mxu1  ;;  %v1136_v33 = vsel %vm346_vm4, %v1082_v28, -inf }
 0xf8b   :  { %v1133_v34 = vpop.f32.mrb[26].mxu1  ;;  %1137 = vmax.xlane.f32.xlu1 %v1136_v33  ;;  %v2808_v33 = vld [vmem:[%s2973_s5] sm:$0xff] }
 0xf8c   :  { %v2172_v35 = vpop.f32.mrb[27].mxu1  ;;  %v1139_v36 = vsel %vm346_vm4, %v1131_v30, -inf }
 0xf8d   :  { %1140 = vmax.xlane.f32.xlu0 %v1139_v36 }
 0xf9c   :  { %1208 = vrot.lane.b32.xlu1 %v2740_v20, %s2350_s27 }
 0xfa0   :  { %1260 = vrot.lane.b32.xlu1 %v2738_v17, %s2351_s28 }
0x1018   :  { %v1138_v37 = vpop.xlane.xlu1 %1137 }
0x1019   :  { %v1142_v38 = vsub.f32 %v1082_v28, %v1138_v37 }
0x101a   :  { %v1141_v4 = vpop.xlane.xlu0 %1140 }
0x101b   :  { %v1144_v40 = vmul.f32 1.442695, %v1142_v38  ;;  %v1143_v41 = vsub.f32 %v1131_v30, %v1141_v4 }
0x101c   :  { %v1209_v42 = vpop.permute.xlu1 %1208 }
0x101d   :  { %2296 = vpow2.f32 %v1144_v40  ;;  %v1146_v43 = vmul.f32 1.442695, %v1143_v41  ;;  %v1214_v44 = vsel %vm376_vm5, %v1209_v42, 0 }
0x101e   :  { %2180 = vmatpush3.bf16.msra.mxu1 %v1214_v44 }
0x101f   :  { %2298 = vpow2.f32 %v1146_v43  ;;  %2191 = vmatprep.subr.bf16.mxu1 %v2346_v39 }
0x1020   :  { %v1261_v1 = vpop.permute.xlu1 %1260 }
0x1021   :  { %v1266_v61 = vsel %vm250_vm3, %v1261_v1, 0 }
0x1027   :  { %v2297_v45 = vpop.eup %2296 }
0x1028   :  { %v1148_v46 = vsel %vm346_vm4, %v2297_v45, 0.0 }
0x1029   :  { %v2299_v47 = vpop.eup %2298  ;;  %1149 = vadd.xlane.f32.xlu0 %v1148_v46  ;;  %v1490_v46 = vld [vmem:[%s2970_s2 + $0x150] sm:$0xff] }
0x102a   :  { %v1151_v48 = vsel %vm346_vm4, %v2299_v47, 0.0 }
0x102b   :  { %1152 = vadd.xlane.f32.xlu1 %v1151_v48  ;;  %v1492_v48 = vld [vmem:[%s2970_s2 + $0x160] sm:$0xff] }
0x103c   :  { %1310 = vrot.lane.b32.xlu1 %v2740_v20, %s2351_s28 }
0x103f   :  { %1160 = vrot.lane.b32.xlu0 %v2738_v17, %s2350_s27 }
0x1040   :  { %1308 = vrot.lane.b32.xlu1 %v2740_v20, %s2352_s14 }
0x1043   :  { %1258 = vrot.lane.b32.xlu0 %v2738_v17, %s2352_s14 }
0x10b6   :  { %v1150_v49 = vpop.xlane.xlu0 %1149 }
0x10b7   :  { %2300 = vrcp.f32 %v1150_v49  ;;  %v1493_v49 = vld [vmem:[%s2970_s2 + $0x168] sm:$0xff] }
0x10b8   :  { %v1153_v50 = vpop.xlane.xlu1 %1152 }
0x10b9   :  { %2302 = vrcp.f32 %v1153_v50  ;;  %v1496_v50 = vpack.c.bf16 %v1493_v49, %v1492_v48  ;;  %v1664_v48 = vld [vmem:[%s2970_s2 + $0x198] sm:$0xff]  ;;  %v1665_v49 = vld [vmem:[%s2970_s2 + $0x1a0] sm:$0xff] }
0x10ba   :  { %v1161_v51 = vpop.permute.xlu0 %1160 }
0x10bb   :  { %v1166_v52 = vsel %vm376_vm5, %v1161_v51, 0 }
0x10bc   :  { %2174 = vmatpush3.bf16.msra.mxu0 %v1166_v52  ;;  %v1311_v60 = vpop.permute.xlu1 %1310 }
0x10bd   :  { %2185 = vmatprep.subr.bf16.mxu0 %v2346_v39  ;;  %v1316_v63 = vsel %vm250_vm3, %v1311_v60, 0 }
0x10be   :  { %v1259_v0 = vpop.permute.xlu0 %1258 }
0x10c0   :  { %v1309_v2 = vpop.permute.xlu1 %1308 }
0x10c1   :  { %v2301_v53 = vpop.eup %2300 }
0x10c2   :  { %v1156_v54 = vmul.f32 %v2301_v53, %v2297_v45 }
0x10c3   :  { %v2303_v55 = vpop.eup %2302 }
0x10c4   :  { %v1157_v56 = vmul.f32 %v2303_v55, %v2299_v47  ;;  %v1158_v59 = vpack.c.bf16 %v1156_v54, %v1156_v54  ;;  %v1491_v47 = vld [vmem:[%s2970_s2 + $0x158] sm:$0xff] }
0x10c5   :  { %v1495_v1 = vpack.c.bf16 %v1491_v47, %v1490_v46  ;;  %v1662_v46 = vld [vmem:[%s2970_s2 + $0x188] sm:$0xff]  ;;  %v1663_v47 = vld [vmem:[%s2970_s2 + $0x190] sm:$0xff] }
0x10c6   :  { %2176 = vmatmul.mubr.msk.bf16.vlgmr.msra.gmra.mrb[32].mxu0 %vm346_vm4, %v1158_v59  ;;  %v1159_v62 = vpack.c.bf16 %v1157_v56, %v1157_v56 }
0x10c7   :  { %2186 = vmatpush3.bf16.xpose.msra.mxu0 %v1266_v61  ;;  %2187 = vmatprep.mubr.msk.bf16.mxu0 %vm2347_vm2, %v2346_v39 }
0x10c8   :  { %2182 = vmatmul.mubr.msk.bf16.vlgmr.msra.gmra.mrb[28].mxu1 %vm346_vm4, %v1159_v62  ;;  %2197 = vmatprep.subr.bf16.mxu0 %v2346_v39 }
0x10c9   :  { %2192 = vmatpush3.bf16.xpose.msra.mxu1 %v1316_v63  ;;  %2193 = vmatprep.mubr.msk.bf16.mxu1 %vm2347_vm2, %v2346_v39 }
0x10ca   :  { %2203 = vmatprep.subr.bf16.mxu1 %v2346_v39 }
0x10ce   :  { %2188 = vmatmul.mubr.msk.bf16.vlgmr.msra.gmra.mrb[36].mxu0 %vm250_vm3, %v1259_v0 }
0x10cf   :  { %2199 = vmatprep.mubr.msk.bf16.mxu0 %vm2347_vm2, %v2346_v39 }
0x10d0   :  { %2194 = vmatmul.mubr.msk.bf16.vlgmr.msra.gmra.mrb[32].mxu1 %vm250_vm3, %v1309_v2 }
0x10d1   :  { %2205 = vmatprep.mubr.msk.bf16.mxu1 %vm2347_vm2, %v2346_v39 }
0x1199   :  { %v1202_v3 = vpop.f32.mrb[32].mxu0 }
0x119a   :  { %1256 = vst.msk [vmem:[#allocation2] sm:$0xff] %vm250_vm3, %v1202_v3  ;;  %v2177_v5 = vpop.f32.mrb[33].mxu0  ;;  %v1989_v3 = vld [vmem:[%s2970_s2 + $0x170] ss:$0 sm:$0xff] }
0x119b   :  { %v1205_v6 = vpop.f32.mrb[34].mxu0  ;;  %v1250_v7 = vpop.f32.mrb[28].mxu1 }
0x119c   :  { %1257 = vst.msk [vmem:[#allocation2 + $0x8] sm:$0xff] %vm250_vm3, %v1250_v7  ;;  %v2178_v8 = vpop.f32.mrb[35].mxu0  ;;  %v2183_v11 = vpop.f32.mrb[29].mxu1 }
0x119d   :  { %v1253_v12 = vpop.f32.mrb[30].mxu1 }
0x119e   :  { %v2184_v13 = vpop.f32.mrb[31].mxu1 }
0x11a1   :  { %v1302_v14 = vpop.f32.mrb[36].mxu0 }
0x11a2   :  { %v1303_v15 = vadd.f32 %v1302_v14, %v2540_v23  ;;  %v2189_v16 = vpop.f32.mrb[37].mxu0 }
0x11a3   :  { %v1305_v18 = vpop.f32.mrb[38].mxu0  ;;  %v1352_v19 = vpop.f32.mrb[32].mxu1 }
0x11a4   :  { %v1353_v39 = vadd.f32 %v1352_v19, %v2542_v24  ;;  %v2190_v21 = vpop.f32.mrb[39].mxu0  ;;  %v2195_v22 = vpop.f32.mrb[33].mxu1  ;;  %v1358_v25 = vsel %vm346_vm4, %v1303_v15, -inf }
0x11a5   :  { %v1355_v26 = vpop.f32.mrb[34].mxu1  ;;  %1359 = vmax.xlane.f32.xlu0 %v1358_v25 }
0x11a6   :  { %v2196_v27 = vpop.f32.mrb[35].mxu1  ;;  %v1361_v28 = vsel %vm346_vm4, %v1353_v39, -inf }
0x11a7   :  { %1362 = vmax.xlane.f32.xlu1 %v1361_v28 }
0x11b8   :  { %1430 = vrot.lane.b32.xlu1 %v2740_v20, %s2353_s15 }
0x1232   :  { %v1360_v29 = vpop.xlane.xlu0 %1359 }
0x1233   :  { %v1364_v23 = vsub.f32 %v1303_v15, %v1360_v29  ;;  %v1589_v29 = vld [vmem:[%s2972_s4 + $0x30] sm:$0xff] }
0x1234   :  { %v1363_v57 = vpop.xlane.xlu1 %1362 }
0x1235   :  { %v1366_v58 = vmul.f32 1.442695, %v1364_v23  ;;  %v1365_v30 = vsub.f32 %v1353_v39, %v1363_v57  ;;  %v1590_v57 = vld [vmem:[%s2972_s4 + $0x38] sm:$0xff] }
0x1237   :  { %2304 = vpow2.f32 %v1366_v58  ;;  %v1368_v24 = vmul.f32 1.442695, %v1365_v30  ;;  %v1591_v58 = vld [vmem:[%s2972_s4 + $0x40] sm:$0xff] }
0x1238   :  { %v1431_v31 = vpop.permute.xlu1 %1430  ;;  %v1595_v30 = vpack.c.bf16 %v1591_v58, %v1590_v57 }
0x1239   :  { %2306 = vpow2.f32 %v1368_v24  ;;  %v1436_v32 = vsel %vm376_vm5, %v1431_v31, 0 }
0x123a   :  { %2204 = vmatpush3.bf16.msra.mxu1 %v1436_v32 }
0x123b   :  { %2217 = vmatprep.subr.bf16.mxu1 %v2808_v33 }
0x1241   :  { %v2305_v20 = vpop.eup %2304 }
0x1242   :  { %v1370_v34 = vsel %vm346_vm4, %v2305_v20, 0.0 }
0x1243   :  { %v2307_v35 = vpop.eup %2306  ;;  %1371 = vadd.xlane.f32.xlu0 %v1370_v34 }
0x1244   :  { %v1373_v36 = vsel %vm346_vm4, %v2307_v35, 0.0 }
0x1247   :  { %1374 = vadd.xlane.f32.xlu0 %v1373_v36 }
0x125d   :  { %1382 = vrot.lane.b32.xlu0 %v2738_v17, %s2353_s15 }
0x12d0   :  { %v1372_v37 = vpop.xlane.xlu0 %1371 }
0x12d1   :  { %2308 = vrcp.f32 %v1372_v37 }
0x12d4   :  { %v1375_v38 = vpop.xlane.xlu0 %1374 }
0x12d5   :  { %2310 = vrcp.f32 %v1375_v38  ;;  %v1991_v38 = vld [vmem:[%s2970_s2 + $0x178] ss:$0 sm:$0xff] }
0x12d8   :  { %v1383_v4 = vpop.permute.xlu0 %1382 }
0x12d9   :  { %v1388_v40 = vsel %vm376_vm5, %v1383_v4, 0 }
0x12da   :  { %2198 = vmatpush3.bf16.msra.mxu0 %v1388_v40 }
0x12db   :  { %v2309_v41 = vpop.eup %2308  ;;  %2209 = vmatprep.subr.bf16.mxu0 %v2808_v33 }
0x12dc   :  { %v1378_v42 = vmul.f32 %v2309_v41, %v2305_v20 }
0x12de   :  { %v1380_v43 = vpack.c.bf16 %v1378_v42, %v1378_v42  ;;  %v1992_v42 = vld [vmem:[%s2970_s2 + $0x180] ss:$0 sm:$0xff] }
0x12df   :  { %v2311_v44 = vpop.eup %2310 }
0x12e0   :  { %v1379_v45 = vmul.f32 %v2311_v44, %v2307_v35  ;;  %2200 = vmatmul.mubr.msk.bf16.vlgmr.msra.gmra.mrb[40].mxu0 %vm346_vm4, %v1380_v43 }
0x12e1   :  { %2213 = vmatprep.mubr.msk.bf16.mxu0 %vm2347_vm2, %v2808_v33  ;;  %2210 = vmatpush3.bf16.msra.mxu0 %v1495_v1  ;;  %v1671_v1 = vpack.c.bf16 %v1663_v47, %v1662_v46  ;;  %v1769_v46 = vld [vmem:[%s2970_s2 + $0x1f8] sm:$0xff] }
0x12e2   :  { %v1381_v17 = vpack.c.bf16 %v1379_v45, %v1379_v45  ;;  %2211 = vmatprep.subr.bf16.mxu0 %v2808_v33 }
0x12e4   :  { %2206 = vmatmul.mubr.msk.bf16.vlgmr.msra.gmra.mrb[36].mxu1 %vm346_vm4, %v1381_v17 }
0x12e5   :  { %2221 = vmatprep.mubr.msk.bf16.mxu1 %vm2347_vm2, %v2808_v33  ;;  %2212 = vmatpush3.bf16.msra.mxu0 %v1496_v50  ;;  %v1672_v50 = vpack.c.bf16 %v1665_v49, %v1664_v48 }
0x12e6   :  { %2225 = vmatprep.subr.bf16.mxu0 %v2808_v33 }
0x13b3   :  { %v1424_v51 = vpop.f32.mrb[40].mxu0 }
0x13b4   :  { %1480 = vrot.lane.b32.xlu1 %v1424_v51, %s2354_s22  ;;  %v2201_v52 = vpop.f32.mrb[41].mxu0  ;;  %v1666_v51 = vld [vmem:[%s2970_s2 + $0x1a8] sm:$0xff] }
0x13b5   :  { %v1427_v53 = vpop.f32.mrb[42].mxu0  ;;  %v1667_v52 = vld [vmem:[%s2970_s2 + $0x1b0] sm:$0xff] }
0x13b6   :  { %v2202_v54 = vpop.f32.mrb[43].mxu0  ;;  %v1673_v53 = vpack.c.bf16 %v1667_v52, %v1666_v51 }
0x13b7   :  { %v1472_v55 = vpop.f32.mrb[36].mxu1  ;;  %v1668_v54 = vld [vmem:[%s2970_s2 + $0x1b8] sm:$0xff] }
0x13b8   :  { %v2207_v56 = vpop.f32.mrb[37].mxu1  ;;  %1482 = vrot.lane.b32.xlu1 %v1472_v55, %s2354_s22  ;;  %v1669_v55 = vld [vmem:[%s2970_s2 + $0x1c0] sm:$0xff] }
0x13b9   :  { %v1475_v59 = vpop.f32.mrb[38].mxu1  ;;  %v1674_v56 = vpack.c.bf16 %v1669_v55, %v1668_v54  ;;  %v1997_v54 = vld [vmem:[%s2970_s2 + $0x1d0] ss:$0 sm:$0xff] }
0x13ba   :  { %v2208_v60 = vpop.f32.mrb[39].mxu1  ;;  %v1993_v59 = vld [vmem:[%s2972_s4 + $0x48] ss:$0 sm:$0xff] }
0x1426   :  { %v1481_v61 = vpop.permute.xlu1 %1480 }
0x1427   :  { %1486 = vst.msk [vmem:[#allocation2] sm:$0xff] %vm698_vm6, %v1481_v61 }
0x142a   :  { %v1483_v62 = vpop.permute.xlu1 %1482 }
0x142b   :  { %1487 = vst.msk [vmem:[#allocation2 + $0x8] sm:$0xff] %vm698_vm6, %v1483_v62 }
0x142e   :  { %v1488_v63 = vld [vmem:[#allocation2] sm:$0xff] }
0x1432   :  { %v1489_v0 = vld [vmem:[#allocation2 + $0x8] sm:$0xff] }
0x1433   :  { %v1494_v2 = vpack.c.bf16 %v1489_v0, %v1488_v63 }
0x1435   :  { %2214 = vmatmul.mubr.msk.bf16.vlgmr.msra.gmra.mrb[44].mxu0 %vm113_vm1, %v1494_v2 }
0x1436   :  { %2233 = vmatprep.mubr.msk.bf16.mxu0 %vm2347_vm2, %v2808_v33  ;;  %2226 = vmatpush3.bf16.msra.mxu0 %v1671_v1 }
0x1437   :  { %2227 = vmatprep.subr.bf16.mxu0 %v2808_v33 }
0x143a   :  { %2228 = vmatpush3.bf16.msra.mxu0 %v1672_v50 }
0x143b   :  { %2229 = vmatprep.subr.bf16.mxu0 %v2808_v33 }
0x143e   :  { %2230 = vmatpush3.bf16.msra.mxu0 %v1673_v53 }
0x143f   :  { %2231 = vmatprep.subr.bf16.mxu0 %v2808_v33 }
0x1442   :  { %2232 = vmatpush3.bf16.msra.mxu0 %v1674_v56 }
0x1508   :  { %v1539_v5 = vpop.f32.mrb[44].mxu0 }
0x1509   :  { %v1540_v6 = vadd.f32 %v1989_v3, %v1539_v5  ;;  %v2215_v7 = vpop.f32.mrb[45].mxu0 }
0x150a   :  { %v1542_v8 = vpop.f32.mrb[46].mxu0 }
0x150b   :  { %v1543_v11 = vadd.f32 %v1989_v3, %v1542_v8  ;;  %v2216_v12 = vpop.f32.mrb[47].mxu0  ;;  %v1546_v13 = vadd.f32 %v1540_v6, %v2726_v9 }
0x150d   :  { %v1550_v14 = vsel %vm113_vm1, %v1546_v13, 0.0  ;;  %v1547_v15 = vadd.f32 %v1543_v11, %v2728_v10  ;;  %v1588_v10 = vld [vmem:[%s2972_s4 + $0x28] sm:$0xff] }
0x150e   :  { %1551 = vadd.xlane.f32.xlu0 %v1550_v14  ;;  %v1594_v23 = vpack.c.bf16 %v1589_v29, %v1588_v10 }
0x150f   :  { %v1553_v16 = vsel %vm113_vm1, %v1547_v15, 0.0 }
0x1510   :  { %1554 = vadd.xlane.f32.xlu1 %v1553_v16  ;;  %2218 = vmatpush3.bf16.msra.mxu1 %v1594_v23 }
0x1511   :  { %2219 = vmatprep.subr.bf16.mxu1 %v2808_v33 }
0x1514   :  { %2220 = vmatpush3.bf16.msra.mxu1 %v1595_v30 }
0x1515   :  { %2237 = vmatprep.subr.bf16.mxu1 %v2808_v33 }
0x159b   :  { %v1552_v18 = vpop.xlane.xlu0 %1551 }
0x159c   :  { %v1556_v19 = vmul.f32 0.03125, %v1552_v18 }
0x159d   :  { %v1555_v39 = vpop.xlane.xlu1 %1554 }
0x159e   :  { %v1558_v21 = vsub.f32 %v1546_v13, %v1556_v19  ;;  %v1557_v22 = vmul.f32 0.03125, %v1555_v39 }
0x15a0   :  { %v1559_v25 = vsub.f32 %v1547_v15, %v1557_v22  ;;  %v1560_v26 = vmul.f32 %v1558_v21, %v1558_v21 }
0x15a2   :  { %v1562_v27 = vsel %vm113_vm1, %v1560_v26, 0.0  ;;  %v1561_v28 = vmul.f32 %v1559_v25, %v1559_v25 }
0x15a3   :  { %1563 = vadd.xlane.f32.xlu0 %v1562_v27 }
0x15a4   :  { %v1565_v9 = vsel %vm113_vm1, %v1561_v28, 0.0  ;;  %v1995_v28 = vld [vmem:[%s2970_s2 + $0x1c8] ss:$0 sm:$0xff] }
0x15a7   :  { %1566 = vadd.xlane.f32.xlu0 %v1565_v9 }
0x1630   :  { %v1564_v24 = vpop.xlane.xlu0 %1563 }
0x1631   :  { %v1568_v31 = vmul.f32 0.03125, %v1564_v24 }
0x1633   :  { %v1570_v32 = vadd.f32 1e-12, %v1568_v31 }
0x1634   :  { %v1567_v20 = vpop.xlane.xlu0 %1566 }
0x1635   :  { %2312 = vrsqrt.f32 %v1570_v32  ;;  %v1569_v34 = vmul.f32 0.03125, %v1567_v20 }
0x1637   :  { %v1571_v35 = vadd.f32 1e-12, %v1569_v34 }
0x1639   :  { %2314 = vrsqrt.f32 %v1571_v35 }
0x163f   :  { %v2313_v36 = vpop.eup %2312 }
0x1640   :  { %v1574_v37 = vmul.f32 %v2313_v36, %v1558_v21 }
0x1642   :  { %v1580_v40 = vmul.f32 %v1991_v38, %v1574_v37 }
0x1643   :  { %v2315_v4 = vpop.eup %2314 }
0x1644   :  { %v1575_v41 = vmul.f32 %v2315_v4, %v1559_v25  ;;  %v1586_v44 = vadd.f32 %v1992_v42, %v1580_v40 }
0x1646   :  { %v1581_v43 = vmul.f32 %v1991_v38, %v1575_v41 }
0x1648   :  { %v1587_v45 = vadd.f32 %v1992_v42, %v1581_v43  ;;  %v1766_v43 = vld [vmem:[%s2970_s2 + $0x1e0] sm:$0xff] }
0x164a   :  { %v1593_v17 = vpack.c.bf16 %v1587_v45, %v1586_v44 }
0x164c   :  { %2222 = vmatmul.mubr.msk.bf16.vlgmr.msra.gmra.mrb[40].mxu1 %vm113_vm1, %v1593_v17 }
0x164d   :  { %2241 = vmatprep.mubr.msk.bf16.mxu1 %vm2347_vm2, %v2808_v33 }
0x171f   :  { %v1637_v60 = vpop.f32.mrb[40].mxu1 }
0x1720   :  { %v1638_v61 = vadd.f32 %v1993_v59, %v1637_v60  ;;  %v2223_v62 = vpop.f32.mrb[41].mxu1 }
0x1721   :  { %v1640_v63 = vpop.f32.mrb[42].mxu1 }
0x1722   :  { %v1646_v0 = vmul.f32 0.044715, %v1638_v61  ;;  %v1641_v2 = vadd.f32 %v1993_v59, %v1640_v63  ;;  %v2224_v3 = vpop.f32.mrb[43].mxu1  ;;  %v1644_v39 = vmul.f32 0.5, %v1638_v61  ;;  %v1998_v59 = vld [vmem:[%s2970_s2 + $0x1d8] ss:$0 sm:$0xff] }
0x1724   :  { %v1648_v5 = vmul.f32 %v1646_v0, %v1638_v61  ;;  %v1647_v6 = vmul.f32 0.044715, %v1641_v2  ;;  %v1645_v21 = vmul.f32 0.5, %v1641_v2 }
0x1726   :  { %v1650_v7 = vmul.f32 %v1648_v5, %v1638_v61  ;;  %v1649_v8 = vmul.f32 %v1647_v6, %v1641_v2 }
0x1728   :  { %v1652_v11 = vadd.f32 %v1650_v7, %v1638_v61  ;;  %v1651_v12 = vmul.f32 %v1649_v8, %v1641_v2 }
0x172a   :  { %v1654_v13 = vmul.f32 0.7978846, %v1652_v11  ;;  %v1653_v14 = vadd.f32 %v1651_v12, %v1641_v2  ;;  %v1831_v12 = vld [vmem:[%s2970_s2 + $0x208] sm:$0xff] }
0x172c   :  { %2316 = vtanh.f32 %v1654_v13  ;;  %v1655_v15 = vmul.f32 0.7978846, %v1653_v14  ;;  %v1832_v13 = vld [vmem:[%s2970_s2 + $0x210] sm:$0xff] }
0x172d   :  { %v1836_v14 = vpack.c.bf16 %v1832_v13, %v1831_v12 }
0x172e   :  { %2318 = vtanh.f32 %v1655_v15  ;;  %v1833_v15 = vld [vmem:[%s2970_s2 + $0x218] sm:$0xff] }
0x1736   :  { %v2317_v16 = vpop.eup %2316 }
0x1737   :  { %v1658_v18 = vadd.f32 1.0, %v2317_v16  ;;  %v1834_v16 = vld [vmem:[%s2970_s2 + $0x220] sm:$0xff] }
0x1738   :  { %v2319_v19 = vpop.eup %2318 }
0x1739   :  { %v1659_v22 = vadd.f32 1.0, %v2319_v19  ;;  %v1660_v25 = vmul.f32 %v1658_v18, %v1644_v39  ;;  %v1837_v18 = vpack.c.bf16 %v1834_v16, %v1833_v15  ;;  %v1886_v19 = vld [vmem:[%s2969_s1] sm:$0x3] }
0x173b   :  { %v1661_v26 = vmul.f32 %v1659_v22, %v1645_v21 }
0x173d   :  { %v1670_v27 = vpack.c.bf16 %v1661_v26, %v1660_v25 }
0x173f   :  { %2234 = vmatmul.mubr.msk.bf16.vlgmr.msra.gmra.mrb[48].mxu0 %vm893_vm7, %v1670_v27 }
0x1812   :  { %v1717_v9 = vpop.f32.mrb[48].mxu0 }
0x1813   :  { %v1718_v10 = vadd.f32 %v1995_v28, %v1717_v9  ;;  %v2235_v29 = vpop.f32.mrb[49].mxu0  ;;  %v2001_v9 = vld [vmem:[%s2970_s2 + $0x228] ss:$0 sm:$0xff] }
0x1814   :  { %v1720_v23 = vpop.f32.mrb[50].mxu0 }
0x1815   :  { %v1721_v57 = vadd.f32 %v1995_v28, %v1720_v23  ;;  %v2236_v58 = vpop.f32.mrb[51].mxu0  ;;  %v1724_v30 = vadd.f32 %v1718_v10, %v1586_v44  ;;  %v1767_v44 = vld [vmem:[%s2970_s2 + $0x1e8] sm:$0xff] }
0x1816   :  { %v1772_v17 = vpack.c.bf16 %v1767_v44, %v1766_v43 }
0x1817   :  { %v1728_v24 = vsel %vm113_vm1, %v1724_v30, 0.0  ;;  %v1725_v31 = vadd.f32 %v1721_v57, %v1587_v45  ;;  %v1768_v45 = vld [vmem:[%s2970_s2 + $0x1f0] sm:$0xff] }
0x1818   :  { %1729 = vadd.xlane.f32.xlu1 %v1728_v24  ;;  %2238 = vmatpush3.bf16.msra.mxu1 %v1772_v17  ;;  %v1773_v47 = vpack.c.bf16 %v1769_v46, %v1768_v45 }
0x1819   :  { %v1731_v32 = vsel %vm113_vm1, %v1725_v31, 0.0  ;;  %2239 = vmatprep.subr.bf16.mxu1 %v2808_v33 }
0x181a   :  { %1732 = vadd.xlane.f32.xlu0 %v1731_v32 }
0x181c   :  { %2240 = vmatpush3.bf16.msra.mxu1 %v1773_v47 }
0x181d   :  { %2245 = vmatprep.subr.bf16.mxu1 %v2808_v33 }
0x18a5   :  { %v1730_v20 = vpop.xlane.xlu1 %1729 }
0x18a6   :  { %v1734_v34 = vmul.f32 0.03125, %v1730_v20 }
0x18a7   :  { %v1733_v35 = vpop.xlane.xlu0 %1732 }
0x18a8   :  { %v1736_v36 = vsub.f32 %v1724_v30, %v1734_v34  ;;  %v1735_v37 = vmul.f32 0.03125, %v1733_v35 }
0x18aa   :  { %v1737_v38 = vsub.f32 %v1725_v31, %v1735_v37  ;;  %v1738_v4 = vmul.f32 %v1736_v36, %v1736_v36 }
0x18ac   :  { %v1740_v40 = vsel %vm113_vm1, %v1738_v4, 0.0  ;;  %v1739_v41 = vmul.f32 %v1737_v38, %v1737_v38 }
0x18ad   :  { %1741 = vadd.xlane.f32.xlu1 %v1740_v40 }
0x18ae   :  { %v1743_v42 = vsel %vm113_vm1, %v1739_v41, 0.0 }
0x18af   :  { %1744 = vadd.xlane.f32.xlu0 %v1743_v42 }
0x18c5   :  { %1889 = vrot.lane.b32.xlu0 %v1886_v19, %s2355_s17 }
0x193a   :  { %v1742_v48 = vpop.xlane.xlu1 %1741 }
0x193b   :  { %v1746_v1 = vmul.f32 0.03125, %v1742_v48 }
0x193c   :  { %v1745_v49 = vpop.xlane.xlu0 %1744 }
0x193d   :  { %v1748_v50 = vadd.f32 1e-12, %v1746_v1  ;;  %v1747_v51 = vmul.f32 0.03125, %v1745_v49 }
0x193f   :  { %2320 = vrsqrt.f32 %v1748_v50  ;;  %v1749_v52 = vadd.f32 1e-12, %v1747_v51 }
0x1940   :  { %v1890_v34 = vpop.permute.xlu0 %1889 }
0x1941   :  { %2322 = vrsqrt.f32 %v1749_v52 }
0x1949   :  { %v2321_v53 = vpop.eup %2320 }
0x194a   :  { %v1752_v55 = vmul.f32 %v2321_v53, %v1736_v36 }
0x194b   :  { %v2323_v56 = vpop.eup %2322 }
0x194c   :  { %v1758_v60 = vmul.f32 %v1997_v54, %v1752_v55  ;;  %v1753_v61 = vmul.f32 %v2323_v56, %v1737_v38 }
0x194e   :  { %v1764_v62 = vadd.f32 %v1998_v59, %v1758_v60  ;;  %v1759_v63 = vmul.f32 %v1997_v54, %v1753_v61 }
0x1950   :  { %v1765_v0 = vadd.f32 %v1998_v59, %v1759_v63  ;;  %v1770_v2 = vpack.c.bf16 %v1764_v62, %v1764_v62 }
0x1952   :  { %v1771_v3 = vpack.c.bf16 %v1765_v0, %v1765_v0  ;;  %v1781_v6 = vunpack.c.l.b16 %v1770_v2 }
0x1954   :  { %v1782_v5 = vunpack.c.l.b16 %v1771_v3 }
0x1956   :  { %v1783_v7 = vrot.slane %v1782_v5, 7 }
0x1958   :  { %v1785_v8 = vsel %vm1784_vm8, %v1783_v7, %v1781_v6 }
0x1959   :  { %v1786_v11 = vpack.c.b16 %v1785_v8, %v1785_v8 }
0x195b   :  { %2242 = vmatmul.mubr.msk.bf16.vlgmr.msra.gmra.mrb[44].mxu1 %vm113_vm1, %v1786_v11 }
0x195c   :  { %2249 = vmatprep.mubr.msk.bf16.mxu1 %vm2347_vm2, %v2808_v33  ;;  %2246 = vmatpush3.bf16.msra.mxu1 %v1836_v14 }
0x195d   :  { %2247 = vmatprep.subr.bf16.mxu1 %v2808_v33  ;;  %v1999_v33 = vld [vmem:[%s2970_s2 + $0x200] ss:$0 sm:$0xff] }
0x1960   :  { %2248 = vmatpush3.bf16.msra.mxu1 %v1837_v18 }
0x1a2e   :  { %v1824_v39 = vpop.f32.mrb[44].mxu1 }
0x1a2f   :  { %v1825_v21 = vadd.f32 %v1999_v33, %v1824_v39  ;;  %v2243_v22 = vpop.f32.mrb[45].mxu1 }
0x1a30   :  { %v1827_v25 = vpop.f32.mrb[46].mxu1 }
0x1a31   :  { %2324 = vtanh.f32 %v1825_v21  ;;  %v2244_v26 = vpop.f32.mrb[47].mxu1 }
0x1a3b   :  { %v2325_v27 = vpop.eup %2324 }
0x1a3c   :  { %v1835_v28 = vpack.c.bf16 %v2325_v27, %v2325_v27 }
0x1a3e   :  { %2250 = vmatmul.mubr.msk.bf16.vlgmr.msra.gmra.mrb[48].mxu1 %vm113_vm1, %v1835_v28 }
0x1b11   :  { %v1880_v10 = vpop.f32.mrb[48].mxu1 }
0x1b12   :  { %v1881_v29 = vadd.f32 %v2001_v9, %v1880_v10  ;;  %v2251_v23 = vpop.f32.mrb[49].mxu1 }
0x1b13   :  { %v1883_v57 = vpop.f32.mrb[50].mxu1 }
0x1b14   :  { %v1894_v58 = vand.u32 2147483647, %v1881_v29  ;;  %v2252_v30 = vpop.f32.mrb[51].mxu1  ;;  %1917 = vst.msk [vmem:[%s2973_s5] sm:$0x3] %vm1902_vm9, %v1881_v29  ;;  %v1887_v35 = vmax.f32 %v1881_v29, 0.0  ;;  %v1892_v36 = vmul.f32 %v1890_v34, %v1881_v29 }
0x1b16   :  { %v1895_v24 = vsub.f32 0.0, %v1894_v58  ;;  %v1893_v38 = vsub.f32 %v1887_v35, %v1892_v36 }
0x1b18   :  { %v1896_v31 = vmul.f32 1.442695, %v1895_v24 }
0x1b1a   :  { %2326 = vpow2.f32 %v1896_v31 }
0x1b24   :  { %v2327_v32 = vpop.eup %2326 }
0x1b25   :  { %v1898_v20 = vadd.f32 1.0, %v2327_v32 }
0x1b27   :  { %2328 = vlog2.f32 %v1898_v20 }
0x1b31   :  { %v2329_v37 = vpop.eup %2328 }
0x1b32   :  { %v1900_v4 = vmul.f32 0.6931472, %v2329_v37 }
0x1b34   :  { %v1901_v40 = vadd.f32 %v1900_v4, %v1893_v38 }
0x1b36   :  { %v1903_v41 = vsel %vm1902_vm9, %v1901_v40, 0.0 }
0x1b37   :  { %1904 = vadd.xlane.f32.xlu1 %v1903_v41 }
0x1bc4   :  { %v1905_v42 = vpop.xlane.xlu1 %1904 }
0x1bc5   :  { %v1907_v43 = vsel %vm1906_vm10, %v1905_v42, 0.0 }
0x1bc6   :  { %v1908_v44 = vrot.slane %v1907_v43, 4 }
0x1bc8   :  { %v1909_v45 = vadd.f32 %v1908_v44, %v1907_v43 }
0x1bca   :  { %v1910_v17 = vrot.slane %v1909_v45, 2 }
0x1bcc   :  { %v1911_v46 = vadd.f32 %v1910_v17, %v1909_v45 }
0x1bce   :  { %v1912_v47 = vrot.slane %v1911_v46, 1 }
0x1bd0   :  { %v1913_v48 = vadd.f32 %v1912_v47, %v1911_v46 }
0x1bd2   :  { %v1915_v1 = vmul.f32 0.125, %v1913_v48 }
0x1bd4   :  { %1919 = vst.msk [vmem:[%s2973_s5] sm:$0x1] %vm1918_vm11, %v1915_v1 }
0x1bd5   :  { %1924 = vsyncpa [#allocation4], 1 }

</bundles_post_ra>
